<compile_context>
chip_gen: v7x
topology: tpu7x:2x2x1
jax: 0.10.0
libtpu: 0.0.40
codegen_flags: <defaults>
</compile_context>

<pallas_src>
import jax
import jax.numpy as jnp
from jax import lax
from jax.experimental import pallas as pl
from jax.experimental.pallas import tpu as pltpu

_LANE = 128
_SUBLANE = 8
_VMEM_LIMIT = 32 * 1024 * 1024


def _round_up(x, m):
    return ((x + m - 1) // m) * m


def _gru_cell(gi, h, whh_t, b_hh, hidden):
    # PyTorch GRU cell with the input projection gi = x @ Wih^T + bih already
    # computed.  Gate order [r, z, n]; whh_t is (H, 3H) (bf16), h is f32.
    gh = jnp.dot(h.astype(whh_t.dtype), whh_t,
                 preferred_element_type=jnp.float32) + b_hh
    r = jax.nn.sigmoid(gi[:, :hidden] + gh[:, :hidden])
    z = jax.nn.sigmoid(gi[:, hidden:2 * hidden] + gh[:, hidden:2 * hidden])
    n = jnp.tanh(gi[:, 2 * hidden:] + r * gh[:, 2 * hidden:])
    return (1.0 - z) * n + z * h


def _encoder_kernel(emb_ref, wih_fb_ref, bih_fb_ref,
                    whh_f_ref, bhh_f_ref, whh_b_ref, bhh_b_ref,
                    out_ref, hid_ref,
                    gi_ref, fwd_ref, bwd_ref):
    # Bidirectional single-layer GRU over one batch tile.
    #   emb_ref : (S, bb, H) seq-major bf16 embeddings
    #   out_ref : (S, bb, H) bf16 = h_fwd[t] + h_bwd[t]
    #   hid_ref : (bb, H) f32   = h_fwd[S-1] + h_bwd[0]
    S, bb, H = emb_ref.shape
    G = 3 * H

    # Hoisted input projection: one (S*bb, H) x (H, 6H) MXU matmul covering
    # both directions; only h @ Whh^T stays inside the recurrence.
    gi_all = (jnp.dot(emb_ref[...].reshape(S * bb, H), wih_fb_ref[...],
                      preferred_element_type=jnp.float32) + bih_fb_ref[...])
    gi_ref[...] = gi_all.astype(gi_ref.dtype).reshape(S, bb, 2 * G)

    whh_f = whh_f_ref[...]
    bhh_f = bhh_f_ref[...]
    whh_b = whh_b_ref[...]
    bhh_b = bhh_b_ref[...]
    h0 = jnp.zeros((bb, H), jnp.float32)

    def body(t, carry):
        # fused fwd (at t) + bwd (at S-1-t) recurrences: two independent
        # matmul/gate groups in flight per iteration.
        h_f, h_b = carry
        tb = S - 1 - t
        h_f = _gru_cell(gi_ref[t, :, :G], h_f, whh_f, bhh_f, H)
        h_b = _gru_cell(gi_ref[tb, :, G:], h_b, whh_b, bhh_b, H)
        fwd_ref[t] = h_f
        bwd_ref[tb] = h_b
        return h_f, h_b

    h_f, h_b = lax.fori_loop(0, S, body, (h0, h0))

    # One vectorized fwd+bwd add and a single contiguous (lane-dense) store.
    out_ref[...] = (fwd_ref[...] + bwd_ref[...]).astype(out_ref.dtype)
    hid_ref[...] = h_f + h_b


def _decoder_kernel(slot_ref, enc_ref, h0_ref, emb_ref, mask_ref,
                    wih_ref, whh_ref, bih_ref, bhh_ref, wcls_ref, bcls_ref,
                    gate_ref, point_ref,
                    h_scr, w_scr):
    # Grid = (batch_tiles, max_len).  All J slots are decoded together: the
    # GRU batch is (bb*J, H); attention / context / next-token gathers are
    # leading-batch batched matmuls.  h and w are carried across the decode
    # ("arbitrary") grid axis in VMEM scratch.
    k = pl.program_id(1)
    bb, S, H = enc_ref.shape
    Jp = slot_ref.shape[0]
    n_op = gate_ref.shape[2]

    @pl.when(k == 0)
    def _init():
        # w = slot embedding broadcast over batch; h = encoder hidden
        # broadcast over slots (fresh per batch tile).
        w_scr[...] = jnp.broadcast_to(slot_ref[...][None, :, :],
                                      (bb, Jp, H)).reshape(bb * Jp, H)
        h_scr[...] = jnp.broadcast_to(h0_ref[...][:, None, :],
                                      (bb, Jp, H)).reshape(bb * Jp, H)

    enc = enc_ref[...]                        # (bb, S, H) bf16
    pad = mask_ref[...]                       # (bb, S), 1.0 where token == pad
    w = w_scr[...]                            # (bb*Jp, H) bf16
    h = h_scr[...]                            # (bb*Jp, H) f32

    # One GRU step for all (batch, slot) pairs; dropout == identity.
    gi = (jnp.dot(w, wih_ref[...], preferred_element_type=jnp.float32)
          + bih_ref[...])
    h = _gru_cell(gi, h, whh_ref[...], bhh_ref[...], H)
    h_scr[...] = h
    h3 = h.reshape(bb, Jp, H)

    # attn_e[b,j,s] = <enc[b,s,:], h[b,j,:]>, masked softmax over s.
    attn_e = jnp.einsum('bjh,bsh->bjs', h3.astype(enc.dtype), enc,
                        preferred_element_type=jnp.float32)
    attn_e = jnp.where((pad > 0.5)[:, None, :], -1.0e9, attn_e)
    m = jnp.max(attn_e, axis=-1, keepdims=True)
    e = jnp.exp(attn_e - m)
    attn = e / jnp.sum(e, axis=-1, keepdims=True)        # exact division

    @pl.when(k == 0)
    def _gate():
        ctx = jnp.einsum('bjs,bsh->bjh', attn.astype(enc.dtype), enc,
                         preferred_element_type=jnp.float32)
        g = (jnp.dot(ctx.reshape(bb * Jp, H), wcls_ref[...],
                     preferred_element_type=jnp.float32) + bcls_ref[...])
        gate_ref[...] = g.reshape(bb, Jp, n_op)

    p_final = attn + 1e-12
    point_ref[0] = p_final                               # (1, bb, Jp, S) slab

    # Next-token selection (dead on the last decode step — skip it there).
    @pl.when(k + 1 < pl.num_programs(1))
    def _next():
        s_iota = lax.broadcasted_iota(jnp.int32, (bb, Jp, S), 2)
        mx = jnp.max(p_final, axis=-1, keepdims=True)
        idx = jnp.min(jnp.where(p_final >= mx, s_iota, S),
                      axis=-1, keepdims=True)            # first argmax over s
        onehot = (s_iota == idx).astype(emb_ref.dtype)
        # embedding(x[b, idx[b,j]]) == sum_s onehot[b,j,s] * emb[b,s,:]
        w_new = jnp.einsum('bjs,bsh->bjh', onehot, emb_ref[...],
                           preferred_element_type=jnp.float32)
        w_scr[...] = w_new.reshape(bb * Jp, H).astype(w_scr.dtype)


def mgdst_forward(params, input_ids, input_lens, max_value):
    # TODO(synk): input_lens < seq_len (pack_padded_sequence) is not emulated.
    del input_lens
    B0, S = input_ids.shape
    Hp = params['hidden_padded']
    J0 = params['n_slots']
    Jp = params['slot_emb'].shape[0]
    n_op = params['cls_b'].shape[1]
    max_len = int(max_value)

    # Batch tile: pad B to a sublane multiple and pick a tile that divides it.
    if B0 <= 64:
        bb = max(_SUBLANE, _round_up(B0, _SUBLANE))
    else:
        bb = 64
    B = _round_up(B0, bb)
    nb = B // bb
    ids = jnp.pad(input_ids, ((0, B - B0), (0, 0))) if B != B0 else input_ids

    # Single embedding gather (batch-major); seq-major view for the encoder is
    # one XLA transpose rather than a second gather.
    emb_bsh = jnp.take(params['embedding'], ids, axis=0)       # (B,S,Hp) bf16
    emb_sbh = jnp.transpose(emb_bsh, (1, 0, 2))                # (S,B,Hp) bf16
    pad_mask = (ids == 0).astype(jnp.float32)                  # (B,S)

    enc_out_sbh, enc_hidden = pl.pallas_call(
        _encoder_kernel,
        out_shape=(jax.ShapeDtypeStruct((S, B, Hp), jnp.bfloat16),
                   jax.ShapeDtypeStruct((B, Hp), jnp.float32)),
        grid_spec=pltpu.PrefetchScalarGridSpec(
            num_scalar_prefetch=0,
            grid=(nb,),
            in_specs=[
                pl.BlockSpec((S, bb, Hp), lambda i: (0, i, 0)),    # embeddings
                pl.BlockSpec((Hp, 6 * Hp), lambda i: (0, 0)),      # Wih fwd|bwd
                pl.BlockSpec((1, 6 * Hp), lambda i: (0, 0)),
                pl.BlockSpec((Hp, 3 * Hp), lambda i: (0, 0)),      # Whh fwd
                pl.BlockSpec((1, 3 * Hp), lambda i: (0, 0)),
                pl.BlockSpec((Hp, 3 * Hp), lambda i: (0, 0)),      # Whh bwd
                pl.BlockSpec((1, 3 * Hp), lambda i: (0, 0)),
            ],
            out_specs=[
                pl.BlockSpec((S, bb, Hp), lambda i: (0, i, 0)),
                pl.BlockSpec((bb, Hp), lambda i: (i, 0)),
            ],
            scratch_shapes=[
                pltpu.VMEM((S, bb, 6 * Hp), jnp.bfloat16),   # gi (both dirs)
                pltpu.VMEM((S, bb, Hp), jnp.float32),        # fwd states
                pltpu.VMEM((S, bb, Hp), jnp.float32),        # bwd states
            ]),
        compiler_params=pltpu.CompilerParams(
            dimension_semantics=("parallel",),
            vmem_limit_bytes=_VMEM_LIMIT),
    )(emb_sbh, params['enc_wih_fb_t'], params['enc_bih_fb'],
      params['enc_whh_f_t'], params['enc_bhh_f'],
      params['enc_whh_b_t'], params['enc_bhh_b'])

    # Single HBM-level relayout to batch-major for the decoder.
    enc_out_bsh = jnp.transpose(enc_out_sbh, (1, 0, 2))        # (B,S,Hp) bf16

    gate, point = pl.pallas_call(
        _decoder_kernel,
        out_shape=(jax.ShapeDtypeStruct((B, Jp, n_op), jnp.float32),
                   jax.ShapeDtypeStruct((max_len, B, Jp, S), jnp.float32)),
        grid_spec=pltpu.PrefetchScalarGridSpec(
            num_scalar_prefetch=0,
            grid=(nb, max_len),
            in_specs=[
                pl.BlockSpec((Jp, Hp), lambda b, k: (0, 0)),        # slot emb
                pl.BlockSpec((bb, S, Hp), lambda b, k: (b, 0, 0)),  # enc out
                pl.BlockSpec((bb, Hp), lambda b, k: (b, 0)),        # enc hidden
                pl.BlockSpec((bb, S, Hp), lambda b, k: (b, 0, 0)),  # token emb
                pl.BlockSpec((bb, S), lambda b, k: (b, 0)),         # pad mask
                pl.BlockSpec((Hp, 3 * Hp), lambda b, k: (0, 0)),    # dec Wih^T
                pl.BlockSpec((Hp, 3 * Hp), lambda b, k: (0, 0)),    # dec Whh^T
                pl.BlockSpec((1, 3 * Hp), lambda b, k: (0, 0)),
                pl.BlockSpec((1, 3 * Hp), lambda b, k: (0, 0)),
                pl.BlockSpec((Hp, n_op), lambda b, k: (0, 0)),      # cls W^T
                pl.BlockSpec((1, n_op), lambda b, k: (0, 0)),
            ],
            out_specs=[
                pl.BlockSpec((bb, Jp, n_op), lambda b, k: (b, 0, 0)),
                pl.BlockSpec((1, bb, Jp, S), lambda b, k: (k, b, 0, 0)),
            ],
            scratch_shapes=[
                pltpu.VMEM((bb * Jp, Hp), jnp.float32),      # h carry
                pltpu.VMEM((bb * Jp, Hp), jnp.bfloat16),     # w carry
            ]),
        compiler_params=pltpu.CompilerParams(
            dimension_semantics=("parallel", "arbitrary"),
            vmem_limit_bytes=_VMEM_LIMIT),
    )(params['slot_emb'], enc_out_bsh, enc_hidden, emb_bsh, pad_mask,
      params['dec_wih_t'], params['dec_whh_t'],
      params['dec_bih'], params['dec_bhh'],
      params['cls_w_t'], params['cls_b'])

    state_scores = gate[:B0, :J0]                              # (B0,J,n_op)
    gen_scores = jnp.transpose(point, (1, 2, 0, 3))[:B0, :J0]  # (B0,J,L,S)
    return state_scores, gen_scores


def init_params(key, vocab_size, hidden_size, n_op, n_slots):
    # Raw, PyTorch-shaped f32 parameters (same init style as the nn.Module).
    H = hidden_size
    ks = jax.random.split(key, 16)
    s = 1.0 / (H ** 0.5)

    def uni(k, shape):
        return jax.random.uniform(k, shape, jnp.float32, -s, s)

    emb = 0.1 * jax.random.normal(ks[0], (vocab_size, H), jnp.float32)
    emb = emb.at[0].set(0.0)                              # padding_idx = 0
    return dict(
        hidden_size=H,
        embedding=emb,
        enc_wih_f=uni(ks[1], (3 * H, H)), enc_whh_f=uni(ks[2], (3 * H, H)),
        enc_bih_f=uni(ks[3], (3 * H,)),   enc_bhh_f=uni(ks[4], (3 * H,)),
        enc_wih_b=uni(ks[5], (3 * H, H)), enc_whh_b=uni(ks[6], (3 * H, H)),
        enc_bih_b=uni(ks[7], (3 * H,)),   enc_bhh_b=uni(ks[8], (3 * H,)),
        dec_wih=uni(ks[9], (3 * H, H)),   dec_whh=uni(ks[10], (3 * H, H)),
        dec_bih=uni(ks[11], (3 * H,)),    dec_bhh=uni(ks[12], (3 * H,)),
        cls_w=uni(ks[13], (n_op, H)),     cls_b=uni(ks[14], (n_op,)),
        slot_emb=0.1 * jax.random.normal(ks[15], (n_slots, H), jnp.float32),
    )


def pack_params(raw):
    # Pad H to a lane multiple and J to a sublane multiple (exact: padded
    # lanes / gate blocks stay zero), fuse the two encoder input projections,
    # transpose to (in, out) layouts and cast MXU operands to bf16.
    H = raw['hidden_size']
    Hp = _round_up(max(H, _LANE), _LANE)
    J = raw['slot_emb'].shape[0]
    Jp = _round_up(max(J, _SUBLANE), _SUBLANE)
    bf16 = jnp.bfloat16

    def pad_last(x, n):
        return jnp.pad(x, [(0, 0)] * (x.ndim - 1) + [(0, n - x.shape[-1])])

    def pad_gate_w(w):       # (3H, H) -> (3Hp, Hp), per-gate blocks preserved
        out = jnp.zeros((3 * Hp, Hp), w.dtype)
        for g in range(3):
            out = out.at[g * Hp:g * Hp + H, :H].set(w[g * H:(g + 1) * H])
        return out

    def pad_gate_b(b):       # (3H,) -> (3Hp,)
        out = jnp.zeros((3 * Hp,), b.dtype)
        for g in range(3):
            out = out.at[g * Hp:g * Hp + H].set(b[g * H:(g + 1) * H])
        return out

    slot = jnp.zeros((Jp, Hp), jnp.float32).at[:J, :H].set(raw['slot_emb'])

    return dict(
        hidden_padded=Hp,
        n_slots=J,
        embedding=pad_last(raw['embedding'], Hp).astype(bf16),
        enc_wih_fb_t=jnp.concatenate(
            [pad_gate_w(raw['enc_wih_f']).T,
             pad_gate_w(raw['enc_wih_b']).T], axis=1).astype(bf16),
        enc_bih_fb=jnp.concatenate(
            [pad_gate_b(raw['enc_bih_f']),
             pad_gate_b(raw['enc_bih_b'])]).reshape(1, -1),
        enc_whh_f_t=pad_gate_w(raw['enc_whh_f']).T.astype(bf16),
        enc_bhh_f=pad_gate_b(raw['enc_bhh_f']).reshape(1, -1),
        enc_whh_b_t=pad_gate_w(raw['enc_whh_b']).T.astype(bf16),
        enc_bhh_b=pad_gate_b(raw['enc_bhh_b']).reshape(1, -1),
        dec_wih_t=pad_gate_w(raw['dec_wih']).T.astype(bf16),
        dec_whh_t=pad_gate_w(raw['dec_whh']).T.astype(bf16),
        dec_bih=pad_gate_b(raw['dec_bih']).reshape(1, -1),
        dec_bhh=pad_gate_b(raw['dec_bhh']).reshape(1, -1),
        cls_w_t=pad_last(raw['cls_w'], Hp).T,                 # (Hp, n_op) f32
        cls_b=raw['cls_b'].reshape(1, -1),                    # (1, n_op) f32
        slot_emb=slot.astype(bf16),
    )


if __name__ == "__main__":
    B, S, H = 2, 8, 32                    # batch, seq len, hidden
    V, n_op, J, max_value = 50, 4, 3, 4   # vocab, ops, slots, decode length

    key = jax.random.PRNGKey(0)
    pkey, dkey = jax.random.split(key)
    params = pack_params(init_params(pkey, V, H, n_op, J))

    input_ids = jax.random.randint(dkey, (B, S), 1, V, dtype=jnp.int32)
    input_lens = jnp.full((B,), S, dtype=jnp.int32)

    state_scores, gen_scores = mgdst_forward(params, input_ids, input_lens,
                                             max_value)
    jax.block_until_ready((state_scores, gen_scores))

    assert state_scores.shape == (B, J, n_op)
    assert gen_scores.shape == (B, J, max_value, S)
    assert bool(jnp.all(jnp.isfinite(state_scores)))
    assert bool(jnp.all(jnp.isfinite(gen_scores)))
    print("KERNEL_OK")
</pallas_src>

<mosaic_0001>
module attributes {stable_mosaic.version = 11 : i64} {
  func.func @_encoder_kernel(%arg0: i32, %arg1: memref<8x8x128xbf16, #tpu.memory_space<vmem>>, %arg2: memref<128x768xbf16, #tpu.memory_space<vmem>>, %arg3: memref<1x768xf32, #tpu.memory_space<vmem>>, %arg4: memref<128x384xbf16, #tpu.memory_space<vmem>>, %arg5: memref<1x384xf32, #tpu.memory_space<vmem>>, %arg6: memref<128x384xbf16, #tpu.memory_space<vmem>>, %arg7: memref<1x384xf32, #tpu.memory_space<vmem>>, %arg8: memref<8x8x128xbf16, #tpu.memory_space<vmem>>, %arg9: memref<8x128xf32, #tpu.memory_space<vmem>>, %arg10: memref<8x8x768xbf16, #tpu.memory_space<vmem>>, %arg11: memref<8x8x128xf32, #tpu.memory_space<vmem>>, %arg12: memref<8x8x128xf32, #tpu.memory_space<vmem>>) attributes {dimension_semantics = [#tpu.dimension_semantics<parallel>], iteration_bounds = array<i64: 1>, scalar_prefetch = 0 : i64, scratch_operands = 3 : i64, tpu.core_type = #tpu.core_type<tc>, window_params = [{transform_indices = @transform_0, window_bounds = array<i64: 8, 8, 128>}, {pipeline_mode = #tpu.pipeline_mode<synchronous>, transform_indices = @transform_1, window_bounds = array<i64: 128, 768>}, {pipeline_mode = #tpu.pipeline_mode<synchronous>, transform_indices = @transform_2, window_bounds = array<i64: 1, 768>}, {pipeline_mode = #tpu.pipeline_mode<synchronous>, transform_indices = @transform_3, window_bounds = array<i64: 128, 384>}, {pipeline_mode = #tpu.pipeline_mode<synchronous>, transform_indices = @transform_4, window_bounds = array<i64: 1, 384>}, {pipeline_mode = #tpu.pipeline_mode<synchronous>, transform_indices = @transform_5, window_bounds = array<i64: 128, 384>}, {pipeline_mode = #tpu.pipeline_mode<synchronous>, transform_indices = @transform_6, window_bounds = array<i64: 1, 384>}, {transform_indices = @transform_7, window_bounds = array<i64: 8, 8, 128>}, {transform_indices = @transform_8, window_bounds = array<i64: 8, 128>}]} {
    %c0 = arith.constant 0 : index
    %c0_0 = arith.constant 0 : index
    %c0_1 = arith.constant 0 : index
    %0 = vector.load %arg1[%c0, %c0_0, %c0_1] : memref<8x8x128xbf16, #tpu.memory_space<vmem>>, vector<8x8x128xbf16>
    %1 = vector.shape_cast %0 : vector<8x8x128xbf16> to vector<64x128xbf16>
    %c0_2 = arith.constant 0 : index
    %c0_3 = arith.constant 0 : index
    %2 = vector.load %arg2[%c0_2, %c0_3] : memref<128x768xbf16, #tpu.memory_space<vmem>>, vector<128x768xbf16>
    %cst = arith.constant dense<0.000000e+00> : vector<64x768xf32>
    %3 = tpu.matmul %1, %2, %cst {dimension_numbers = #tpu.dot_dimension_numbers<[1], [0], [0], [1], [0, 0, 1, 1], [], []>} : vector<64x128xbf16>, vector<128x768xbf16>, vector<64x768xf32> -> vector<64x768xf32>
    %c0_4 = arith.constant 0 : index
    %c0_5 = arith.constant 0 : index
    %4 = vector.load %arg3[%c0_4, %c0_5] : memref<1x768xf32, #tpu.memory_space<vmem>>, vector<1x768xf32>
    %5 = vector.broadcast %4 : vector<1x768xf32> to vector<64x768xf32>
    %6 = arith.addf %3, %5 : vector<64x768xf32>
    %7 = arith.truncf %6 : vector<64x768xf32> to vector<64x768xbf16>
    %8 = vector.shape_cast %7 : vector<64x768xbf16> to vector<8x8x768xbf16>
    %c0_6 = arith.constant 0 : index
    %c0_7 = arith.constant 0 : index
    %c0_8 = arith.constant 0 : index
    %9 = vector.load %arg10[%c0_6, %c0_7, %c0_8] : memref<8x8x768xbf16, #tpu.memory_space<vmem>>, vector<8x8x768xbf16>
    tpu.vector_store %arg10[%c0_6, %c0_7, %c0_8], %8 {strides = array<i32>} : memref<8x8x768xbf16, #tpu.memory_space<vmem>>, vector<8x8x768xbf16>,
    %c0_9 = arith.constant 0 : index
    %c0_10 = arith.constant 0 : index
    %10 = vector.load %arg4[%c0_9, %c0_10] : memref<128x384xbf16, #tpu.memory_space<vmem>>, vector<128x384xbf16>
    %c0_11 = arith.constant 0 : index
    %c0_12 = arith.constant 0 : index
    %11 = vector.load %arg5[%c0_11, %c0_12] : memref<1x384xf32, #tpu.memory_space<vmem>>, vector<1x384xf32>
    %c0_13 = arith.constant 0 : index
    %c0_14 = arith.constant 0 : index
    %12 = vector.load %arg6[%c0_13, %c0_14] : memref<128x384xbf16, #tpu.memory_space<vmem>>, vector<128x384xbf16>
    %c0_15 = arith.constant 0 : index
    %c0_16 = arith.constant 0 : index
    %13 = vector.load %arg7[%c0_15, %c0_16] : memref<1x384xf32, #tpu.memory_space<vmem>>, vector<1x384xf32>
    %cst_17 = arith.constant 0.000000e+00 : f32
    %14 = vector.broadcast %cst_17 : f32 to vector<8x128xf32>
    %c0_i32 = arith.constant 0 : i32
    %c8_i32 = arith.constant 8 : i32
    %15 = arith.addi %c0_i32, %c8_i32 : i32
    %c1_i32 = arith.constant 1 : i32
    %16:2 = scf.for %arg13 = %c0_i32 to %15 step %c1_i32 iter_args(%arg14 = %14, %arg15 = %14) -> (vector<8x128xf32>, vector<8x128xf32>)  : i32 {
      %c7_i32 = arith.constant 7 : i32
      %24 = arith.subi %c7_i32, %arg13 : i32
      %25 = arith.index_cast %arg13 : i32 to index
      %c0_30 = arith.constant 0 : index
      %c0_31 = arith.constant 0 : index
      %26 = vector.load %arg10[%25, %c0_30, %c0_31] : memref<8x8x768xbf16, #tpu.memory_space<vmem>>, vector<1x8x384xbf16>
      %27 = vector.shape_cast %26 : vector<1x8x384xbf16> to vector<8x384xbf16>
      %28 = arith.truncf %arg14 : vector<8x128xf32> to vector<8x128xbf16>
      %cst_32 = arith.constant dense<0.000000e+00> : vector<8x384xf32>
      %29 = tpu.matmul %28, %10, %cst_32 {dimension_numbers = #tpu.dot_dimension_numbers<[1], [0], [0], [1], [0, 0, 1, 1], [], []>} : vector<8x128xbf16>, vector<128x384xbf16>, vector<8x384xf32> -> vector<8x384xf32>
      %30 = vector.broadcast %11 : vector<1x384xf32> to vector<8x384xf32>
      %31 = arith.addf %29, %30 : vector<8x384xf32>
      %32 = vector.extract_strided_slice %27 {offsets = [0, 0], sizes = [8, 128], strides = [1, 1]} : vector<8x384xbf16> to vector<8x128xbf16>
      %33 = vector.extract_strided_slice %31 {offsets = [0, 0], sizes = [8, 128], strides = [1, 1]} : vector<8x384xf32> to vector<8x128xf32>
      %34 = arith.extf %32 : vector<8x128xbf16> to vector<8x128xf32>
      %35 = arith.addf %34, %33 : vector<8x128xf32>
      %36 = arith.negf %35 : vector<8x128xf32>
      %37 = math.exp %36 : vector<8x128xf32>
      %cst_33 = arith.constant 1.000000e+00 : f32
      %38 = vector.broadcast %cst_33 : f32 to vector<8x128xf32>
      %39 = arith.addf %38, %37 : vector<8x128xf32>
      %40 = arith.divf %38, %39 : vector<8x128xf32>
      %41 = vector.extract_strided_slice %27 {offsets = [0, 128], sizes = [8, 128], strides = [1, 1]} : vector<8x384xbf16> to vector<8x128xbf16>
      %42 = vector.extract_strided_slice %31 {offsets = [0, 128], sizes = [8, 128], strides = [1, 1]} : vector<8x384xf32> to vector<8x128xf32>
      %43 = arith.extf %41 : vector<8x128xbf16> to vector<8x128xf32>
      %44 = arith.addf %43, %42 : vector<8x128xf32>
      %45 = arith.negf %44 : vector<8x128xf32>
      %46 = math.exp %45 : vector<8x128xf32>
      %cst_34 = arith.constant 1.000000e+00 : f32
      %47 = vector.broadcast %cst_34 : f32 to vector<8x128xf32>
      %48 = arith.addf %47, %46 : vector<8x128xf32>
      %49 = arith.divf %47, %48 : vector<8x128xf32>
      %50 = vector.extract_strided_slice %27 {offsets = [0, 256], sizes = [8, 128], strides = [1, 1]} : vector<8x384xbf16> to vector<8x128xbf16>
      %51 = vector.extract_strided_slice %31 {offsets = [0, 256], sizes = [8, 128], strides = [1, 1]} : vector<8x384xf32> to vector<8x128xf32>
      %52 = arith.mulf %40, %51 : vector<8x128xf32>
      %53 = arith.extf %50 : vector<8x128xbf16> to vector<8x128xf32>
      %54 = arith.addf %53, %52 : vector<8x128xf32>
      %55 = math.tanh %54 : vector<8x128xf32>
      %cst_35 = arith.constant 1.000000e+00 : f32
      %56 = vector.broadcast %cst_35 : f32 to vector<8x128xf32>
      %57 = arith.subf %56, %49 : vector<8x128xf32>
      %58 = arith.mulf %57, %55 : vector<8x128xf32>
      %59 = arith.mulf %49, %arg14 : vector<8x128xf32>
      %60 = arith.addf %58, %59 : vector<8x128xf32>
      %61 = arith.index_cast %24 : i32 to index
      %c0_36 = arith.constant 0 : index
      %c384 = arith.constant 384 : index
      %62 = vector.load %arg10[%61, %c0_36, %c384] : memref<8x8x768xbf16, #tpu.memory_space<vmem>>, vector<1x8x384xbf16>
      %63 = vector.shape_cast %62 : vector<1x8x384xbf16> to vector<8x384xbf16>
      %64 = arith.truncf %arg15 : vector<8x128xf32> to vector<8x128xbf16>
      %cst_37 = arith.constant dense<0.000000e+00> : vector<8x384xf32>
      %65 = tpu.matmul %64, %12, %cst_37 {dimension_numbers = #tpu.dot_dimension_numbers<[1], [0], [0], [1], [0, 0, 1, 1], [], []>} : vector<8x128xbf16>, vector<128x384xbf16>, vector<8x384xf32> -> vector<8x384xf32>
      %66 = vector.broadcast %13 : vector<1x384xf32> to vector<8x384xf32>
      %67 = arith.addf %65, %66 : vector<8x384xf32>
      %68 = vector.extract_strided_slice %63 {offsets = [0, 0], sizes = [8, 128], strides = [1, 1]} : vector<8x384xbf16> to vector<8x128xbf16>
      %69 = vector.extract_strided_slice %67 {offsets = [0, 0], sizes = [8, 128], strides = [1, 1]} : vector<8x384xf32> to vector<8x128xf32>
      %70 = arith.extf %68 : vector<8x128xbf16> to vector<8x128xf32>
      %71 = arith.addf %70, %69 : vector<8x128xf32>
      %72 = arith.negf %71 : vector<8x128xf32>
      %73 = math.exp %72 : vector<8x128xf32>
      %cst_38 = arith.constant 1.000000e+00 : f32
      %74 = vector.broadcast %cst_38 : f32 to vector<8x128xf32>
      %75 = arith.addf %74, %73 : vector<8x128xf32>
      %76 = arith.divf %74, %75 : vector<8x128xf32>
      %77 = vector.extract_strided_slice %63 {offsets = [0, 128], sizes = [8, 128], strides = [1, 1]} : vector<8x384xbf16> to vector<8x128xbf16>
      %78 = vector.extract_strided_slice %67 {offsets = [0, 128], sizes = [8, 128], strides = [1, 1]} : vector<8x384xf32> to vector<8x128xf32>
      %79 = arith.extf %77 : vector<8x128xbf16> to vector<8x128xf32>
      %80 = arith.addf %79, %78 : vector<8x128xf32>
      %81 = arith.negf %80 : vector<8x128xf32>
      %82 = math.exp %81 : vector<8x128xf32>
      %cst_39 = arith.constant 1.000000e+00 : f32
      %83 = vector.broadcast %cst_39 : f32 to vector<8x128xf32>
      %84 = arith.addf %83, %82 : vector<8x128xf32>
      %85 = arith.divf %83, %84 : vector<8x128xf32>
      %86 = vector.extract_strided_slice %63 {offsets = [0, 256], sizes = [8, 128], strides = [1, 1]} : vector<8x384xbf16> to vector<8x128xbf16>
      %87 = vector.extract_strided_slice %67 {offsets = [0, 256], sizes = [8, 128], strides = [1, 1]} : vector<8x384xf32> to vector<8x128xf32>
      %88 = arith.mulf %76, %87 : vector<8x128xf32>
      %89 = arith.extf %86 : vector<8x128xbf16> to vector<8x128xf32>
      %90 = arith.addf %89, %88 : vector<8x128xf32>
      %91 = math.tanh %90 : vector<8x128xf32>
      %cst_40 = arith.constant 1.000000e+00 : f32
      %92 = vector.broadcast %cst_40 : f32 to vector<8x128xf32>
      %93 = arith.subf %92, %85 : vector<8x128xf32>
      %94 = arith.mulf %93, %91 : vector<8x128xf32>
      %95 = arith.mulf %85, %arg15 : vector<8x128xf32>
      %96 = arith.addf %94, %95 : vector<8x128xf32>
      %97 = arith.index_cast %arg13 : i32 to index
      %c0_41 = arith.constant 0 : index
      %c0_42 = arith.constant 0 : index
      %98 = vector.load %arg11[%97, %c0_41, %c0_42] : memref<8x8x128xf32, #tpu.memory_space<vmem>>, vector<1x8x128xf32>
      %99 = vector.shape_cast %98 : vector<1x8x128xf32> to vector<8x128xf32>
      %100 = vector.shape_cast %60 : vector<8x128xf32> to vector<1x8x128xf32>
      tpu.vector_store %arg11[%97, %c0_41, %c0_42], %100 {strides = array<i32>} : memref<8x8x128xf32, #tpu.memory_space<vmem>>, vector<1x8x128xf32>,
      %101 = arith.index_cast %24 : i32 to index
      %c0_43 = arith.constant 0 : index
      %c0_44 = arith.constant 0 : index
      %102 = vector.load %arg12[%101, %c0_43, %c0_44] : memref<8x8x128xf32, #tpu.memory_space<vmem>>, vector<1x8x128xf32>
      %103 = vector.shape_cast %102 : vector<1x8x128xf32> to vector<8x128xf32>
      %104 = vector.shape_cast %96 : vector<8x128xf32> to vector<1x8x128xf32>
      tpu.vector_store %arg12[%101, %c0_43, %c0_44], %104 {strides = array<i32>} : memref<8x8x128xf32, #tpu.memory_space<vmem>>, vector<1x8x128xf32>,
      scf.yield %60, %96 : vector<8x128xf32>, vector<8x128xf32>
    }
    %c8_i32_18 = arith.constant 8 : i32
    %c0_19 = arith.constant 0 : index
    %c0_20 = arith.constant 0 : index
    %c0_21 = arith.constant 0 : index
    %17 = vector.load %arg11[%c0_19, %c0_20, %c0_21] : memref<8x8x128xf32, #tpu.memory_space<vmem>>, vector<8x8x128xf32>
    %c0_22 = arith.constant 0 : index
    %c0_23 = arith.constant 0 : index
    %c0_24 = arith.constant 0 : index
    %18 = vector.load %arg12[%c0_22, %c0_23, %c0_24] : memref<8x8x128xf32, #tpu.memory_space<vmem>>, vector<8x8x128xf32>
    %19 = arith.addf %17, %18 : vector<8x8x128xf32>
    %20 = arith.truncf %19 : vector<8x8x128xf32> to vector<8x8x128xbf16>
    %c0_25 = arith.constant 0 : index
    %c0_26 = arith.constant 0 : index
    %c0_27 = arith.constant 0 : index
    %21 = vector.load %arg8[%c0_25, %c0_26, %c0_27] : memref<8x8x128xbf16, #tpu.memory_space<vmem>>, vector<8x8x128xbf16>
    tpu.vector_store %arg8[%c0_25, %c0_26, %c0_27], %20 {strides = array<i32>} : memref<8x8x128xbf16, #tpu.memory_space<vmem>>, vector<8x8x128xbf16>,
    %22 = arith.addf %16#0, %16#1 : vector<8x128xf32>
    %c0_28 = arith.constant 0 : index
    %c0_29 = arith.constant 0 : index
    %23 = vector.load %arg9[%c0_28, %c0_29] : memref<8x128xf32, #tpu.memory_space<vmem>>, vector<8x128xf32>
    tpu.vector_store %arg9[%c0_28, %c0_29], %22 {strides = array<i32>} : memref<8x128xf32, #tpu.memory_space<vmem>>, vector<8x128xf32>,
    return
  }
  func.func @transform_0(%arg0: i32) -> (i32, i32, i32) {
    %c0_i32 = arith.constant 0 : i32
    %c0_i32_0 = arith.constant 0 : i32
    %c0_i32_1 = arith.constant 0 : i32
    return %c0_i32, %arg0, %c0_i32_0 : i32, i32, i32
  }
  func.func @transform_1(%arg0: i32) -> (i32, i32) {
    %c0_i32 = arith.constant 0 : i32
    %c0_i32_0 = arith.constant 0 : i32
    %c0_i32_1 = arith.constant 0 : i32
    return %c0_i32, %c0_i32_0 : i32, i32
  }
  func.func @transform_2(%arg0: i32) -> (i32, i32) {
    %c0_i32 = arith.constant 0 : i32
    %c0_i32_0 = arith.constant 0 : i32
    %c0_i32_1 = arith.constant 0 : i32
    return %c0_i32, %c0_i32_0 : i32, i32
  }
  func.func @transform_3(%arg0: i32) -> (i32, i32) {
    %c0_i32 = arith.constant 0 : i32
    %c0_i32_0 = arith.constant 0 : i32
    %c0_i32_1 = arith.constant 0 : i32
    return %c0_i32, %c0_i32_0 : i32, i32
  }
  func.func @transform_4(%arg0: i32) -> (i32, i32) {
    %c0_i32 = arith.constant 0 : i32
    %c0_i32_0 = arith.constant 0 : i32
    %c0_i32_1 = arith.constant 0 : i32
    return %c0_i32, %c0_i32_0 : i32, i32
  }
  func.func @transform_5(%arg0: i32) -> (i32, i32) {
    %c0_i32 = arith.constant 0 : i32
    %c0_i32_0 = arith.constant 0 : i32
    %c0_i32_1 = arith.constant 0 : i32
    return %c0_i32, %c0_i32_0 : i32, i32
  }
  func.func @transform_6(%arg0: i32) -> (i32, i32) {
    %c0_i32 = arith.constant 0 : i32
    %c0_i32_0 = arith.constant 0 : i32
    %c0_i32_1 = arith.constant 0 : i32
    return %c0_i32, %c0_i32_0 : i32, i32
  }
  func.func @transform_7(%arg0: i32) -> (i32, i32, i32) {
    %c0_i32 = arith.constant 0 : i32
    %c0_i32_0 = arith.constant 0 : i32
    %c0_i32_1 = arith.constant 0 : i32
    return %c0_i32, %arg0, %c0_i32_0 : i32, i32, i32
  }
  func.func @transform_8(%arg0: i32) -> (i32, i32) {
    %c0_i32 = arith.constant 0 : i32
    %c0_i32_0 = arith.constant 0 : i32
    return %arg0, %c0_i32 : i32, i32
  }
}

</mosaic_0001>

<bundles_post_ra>
// kernel: tpu_custom_call.1
= control target key start
LH: loop header
LB: loop body
LE: loop exit
PB: predicated region body
PF: predicated region fallthrough
CT: control target
= control target key end

     0   :  { %14 = vsyncpa [#allocation6], 0  ;;  %s2605_s0 = inlined_call_operand.hbm [shape: bf16[8,8,128], index: 0, kind: input, shape index: {}]   ;;  %s2606_s1 = inlined_call_operand.hbm [shape: bf16[128,768], index: 1, kind: input, shape index: {}]   ;;  %s2607_s2 = inlined_call_operand.vmem [shape: f32[1,768], index: 2, kind: input, shape index: {}]   ;;  %s2608_s3 = inlined_call_operand.hbm [shape: bf16[128,384], index: 3, kind: input, shape index: {}]   ;;  %s2609_s4 = inlined_call_operand.vmem [shape: f32[1,384], index: 4, kind: input, shape index: {}]   ;;  %s2610_s5 = inlined_call_operand.hbm [shape: bf16[128,384], index: 5, kind: input, shape index: {}]   ;;  %s2611_s6 = inlined_call_operand.vmem [shape: f32[1,384], index: 6, kind: input, shape index: {}]   ;;  %s2612_s7 = inlined_call_operand.hbm [shape: bf16[8,8,128], index: 7, kind: output, shape index: {0}]   ;;  %s2613_s8 = inlined_call_operand.hbm [shape: f32[8,128], index: 8, kind: output, shape index: {1}]  }
   0x1   :  { %15 = vsyncpa [#allocation9], 0 }
   0x2   :  { %16 = vsyncpa [#allocation12], 0 }
   0x3   :  { %17 = vsyncpa [#allocation7], 0 }
   0x4   :  { %18 = vsyncpa [#allocation15], 0  ;;  %s2073_s27 = smov [#allocation8]   ;;  %s1907_s9 = scalar_lea.hbm %s2606_s1, 6144 }
   0x5   :  { %s36_s28 = sshll.u32 %s2073_s27, 4  ;;  %p1908_p0 = scmp.ne.s32.totalorder %s2606_s1, %s1907_s9  ;;  %s37_s28 = int_to_ptr.vmem [resolvable:$true] %s36_s28 }
   0x6   :  { %p1911_p1 = scmp.lt.u32.totalorder %s1907_s9, %s2606_s1 }
   0x8   :  { %p1913_p2 = pnand %p1911_p1, %p1908_p0 }
   0xa   :  { %1916 = shalt.err (!%p1913_p2)
}
   0xb   :  { %s1917_s14 = scalar_lea.vmem %s37_s28, 6144  ;;  %p1922_p4 = scmp.lt.s32.totalorder %s37_s28, %s37_s28 }
   0xc   :  { %p1918_p3 = scmp.ne.s32.totalorder %s37_s28, %s1917_s14  ;;  %p1923_p5 = scmp.lt.s32.totalorder %s1917_s14, %s1917_s14 }
   0xe   :  { %p1924_p6 = por %p1923_p5, %p1922_p4 }
  0x10   :  { %p1925_p7 = pnand %p1924_p6, %p1918_p3 }
  0x12   :  { %1928 = shalt.err (!%p1925_p7)
}
  0x13   :  { %s2074_s15 = smov 384   ;;  %s2075_s16 = smov 24  }
  0x14   :  { %42 = dma.hbm_to_vmem [thread:$0]  %s2606_s1, 6144, %s37_s28, [#allocation9], %s2074_s15, %s2074_s15, %s2075_s16  }
  0x15   :  { %s2076_s19 = smov [#allocation5]   ;;  %s1929_s23 = scalar_lea.hbm %s2605_s0, 512 }
  0x16   :  { %s24_s20 = sshll.u32 %s2076_s19, 4  ;;  %p1930_p8 = scmp.ne.s32.totalorder %s2605_s0, %s1929_s23  ;;  %s25_s20 = int_to_ptr.vmem [resolvable:$true] %s24_s20 }
  0x17   :  { %p1933_p9 = scmp.lt.u32.totalorder %s1929_s23, %s2605_s0 }
  0x19   :  { %p1935_p10 = pnand %p1933_p9, %p1930_p8 }
  0x1b   :  { %1938 = shalt.err (!%p1935_p10)
}
  0x1c   :  { %s1939_s29 = scalar_lea.vmem %s25_s20, 512  ;;  %p1944_p12 = scmp.lt.s32.totalorder %s25_s20, %s25_s20 }
  0x1d   :  { %p1940_p11 = scmp.ne.s32.totalorder %s25_s20, %s1939_s29  ;;  %p1945_p13 = scmp.lt.s32.totalorder %s1939_s29, %s1939_s29 }
  0x1f   :  { %p1946_p0 = por %p1945_p13, %p1944_p12 }
  0x21   :  { %p1947_p1 = pnand %p1946_p0, %p1940_p11 }
  0x23   :  { %1950 = shalt.err (!%p1947_p1)
}
  0x24   :  { %s2077_s1 = smov 64   ;;  %s2078_s28 = smov 4  }
  0x25   :  { %30 = dma.hbm_to_vmem [thread:$0]  %s2605_s0, 512, %s25_s20, [#allocation6], %s2077_s1, %s2077_s1, %s2078_s28  }
  0x26   :  { %s2079_s10 = smov [#allocation10]   ;;  %s1951_s14 = scalar_lea.hbm %s2608_s3, 3072 }
  0x27   :  { %s50_s11 = sshll.u32 %s2079_s10, 4  ;;  %p1952_p2 = scmp.ne.s32.totalorder %s2608_s3, %s1951_s14  ;;  %s51_s11 = int_to_ptr.vmem [resolvable:$true] %s50_s11 }
  0x28   :  { %p1955_p3 = scmp.lt.u32.totalorder %s1951_s14, %s2608_s3 }
  0x2a   :  { %p1957_p4 = pnand %p1955_p3, %p1952_p2 }
  0x2c   :  { %1960 = shalt.err (!%p1957_p4)
}
  0x2d   :  { %s1961_s19 = scalar_lea.vmem %s51_s11, 3072  ;;  %p1966_p6 = scmp.lt.s32.totalorder %s51_s11, %s51_s11 }
  0x2e   :  { %p1962_p5 = scmp.ne.s32.totalorder %s51_s11, %s1961_s19  ;;  %p1967_p7 = scmp.lt.s32.totalorder %s1961_s19, %s1961_s19 }
  0x30   :  { %p1968_p8 = por %p1967_p7, %p1966_p6 }
  0x32   :  { %p1969_p9 = pnand %p1968_p8, %p1962_p5 }
  0x34   :  { %1972 = shalt.err (!%p1969_p9)
}
  0x35   :  { %s2080_s0 = smov 192   ;;  %s2081_s20 = smov 12  }
  0x36   :  { %56 = dma.hbm_to_vmem [thread:$0]  %s2608_s3, 3072, %s51_s11, [#allocation9], %s2080_s0, %s2080_s0, %s2081_s20  }
  0x37   :  { %s2082_s23 = smov [#allocation11]   ;;  %s1973_s27 = scalar_lea.hbm %s2610_s5, 3072 }
  0x38   :  { %s64_s24 = sshll.u32 %s2082_s23, 4  ;;  %p1974_p10 = scmp.ne.s32.totalorder %s2610_s5, %s1973_s27  ;;  %s65_s24 = int_to_ptr.vmem [resolvable:$true] %s64_s24 }
  0x39   :  { %p1977_p11 = scmp.lt.u32.totalorder %s1973_s27, %s2610_s5 }
  0x3b   :  { %p1979_p12 = pnand %p1977_p11, %p1974_p10 }
  0x3d   :  { %1982 = shalt.err (!%p1979_p12)
}
  0x3e   :  { %s1983_s12 = scalar_lea.vmem %s65_s24, 3072  ;;  %p1988_p0 = scmp.lt.s32.totalorder %s65_s24, %s65_s24 }
  0x3f   :  { %p1984_p13 = scmp.ne.s32.totalorder %s65_s24, %s1983_s12  ;;  %p1989_p1 = scmp.lt.s32.totalorder %s1983_s12, %s1983_s12 }
  0x41   :  { %p1990_p2 = por %p1989_p1, %p1988_p0 }
  0x43   :  { %p1991_p3 = pnand %p1990_p2, %p1984_p13 }
  0x45   :  { %1994 = shalt.err (!%p1991_p3)
}
  0x46   :  { %70 = dma.hbm_to_vmem [thread:$0]  %s2610_s5, 3072, %s65_s24, [#allocation12], %s2080_s0, %s2080_s0, %s2081_s20  }
  0x47   :  { %2051 = dma.done.wait [#allocation6], 512  }
  0x48   :  { %2052 = vsyncadd [#allocation6], 4294966784 }
  0x49   :  { %2053 = dma.done.wait [#allocation9], 9216  }
  0x4a   :  { %2054 = vsyncadd [#allocation9], 4294958080 }
  0x4b   :  { %2055 = dma.done.wait [#allocation12], 3072  }
  0x4c   :  { %2056 = vsyncadd [#allocation12], 4294964224  ;;  %v2614_v0 = vmov 0   ;;  %v2187_v1 = vld [vmem:[#allocation10] sm:$0xff]  ;;  %v2189_v2 = vld [vmem:[#allocation10 + $0x8] sm:$0xf] }
  0x4d   :  { %470 = vmatprep.mubr.bf16.mxu0 %v2614_v0  ;;  %543 = vmatprep.mubr.bf16.mxu1 %v2614_v0  ;;  %2645 = vst [vmem:[#allocation21_spill] sm:$0xff] %v2187_v1  ;;  %2646 = vst [vmem:[#allocation22_spill] sm:$0xff] %v2189_v2  ;;  %v2191_v3 = vld [vmem:[#allocation10 + $0xc] sm:$0xff]  ;;  %v2193_v4 = vld [vmem:[#allocation10 + $0x14] sm:$0xf] }
  0x4e   :  { %2647 = vst [vmem:[#allocation23_spill] sm:$0xff] %v2191_v3  ;;  %2648 = vst [vmem:[#allocation24_spill] sm:$0xff] %v2193_v4  ;;  %v2195_v5 = vld [vmem:[#allocation10 + $0x18] sm:$0xff]  ;;  %v2197_v6 = vld [vmem:[#allocation10 + $0x20] sm:$0xf] }
  0x4f   :  { %2649 = vst [vmem:[#allocation25_spill] sm:$0xff] %v2195_v5  ;;  %2650 = vst [vmem:[#allocation26_spill] sm:$0xff] %v2197_v6  ;;  %v2199_v7 = vld [vmem:[#allocation10 + $0x24] sm:$0xff]  ;;  %v2201_v8 = vld [vmem:[#allocation10 + $0x2c] sm:$0xf] }
  0x50   :  { %2651 = vst [vmem:[#allocation27_spill] sm:$0xff] %v2199_v7  ;;  %2652 = vst [vmem:[#allocation28_spill] sm:$0xff] %v2201_v8  ;;  %v2203_v9 = vld [vmem:[#allocation10 + $0x30] sm:$0xff]  ;;  %v2205_v10 = vld [vmem:[#allocation10 + $0x38] sm:$0xf] }
  0x51   :  { %2653 = vst [vmem:[#allocation29_spill] sm:$0xff] %v2203_v9  ;;  %2654 = vst [vmem:[#allocation30_spill] sm:$0xff] %v2205_v10  ;;  %v2207_v11 = vld [vmem:[#allocation10 + $0x3c] sm:$0xff]  ;;  %v2209_v12 = vld [vmem:[#allocation10 + $0x44] sm:$0xf] }
  0x52   :  { %2655 = vst [vmem:[#allocation31_spill] sm:$0xff] %v2207_v11  ;;  %2656 = vst [vmem:[#allocation32_spill] sm:$0xff] %v2209_v12  ;;  %v2211_v13 = vld [vmem:[#allocation10 + $0x48] sm:$0xff]  ;;  %v2213_v14 = vld [vmem:[#allocation10 + $0x50] sm:$0xf] }
  0x53   :  { %2657 = vst [vmem:[#allocation33_spill] sm:$0xff] %v2211_v13  ;;  %2658 = vst [vmem:[#allocation34_spill] sm:$0xff] %v2213_v14  ;;  %v2215_v15 = vld [vmem:[#allocation10 + $0x54] sm:$0xff]  ;;  %v2217_v16 = vld [vmem:[#allocation10 + $0x5c] sm:$0xf] }
  0x54   :  { %2659 = vst [vmem:[#allocation35_spill] sm:$0xff] %v2215_v15  ;;  %2660 = vst [vmem:[#allocation36_spill] sm:$0xff] %v2217_v16  ;;  %v2219_v17 = vld [vmem:[#allocation10 + $0x60] sm:$0xff]  ;;  %v2221_v18 = vld [vmem:[#allocation10 + $0x68] sm:$0xf] }
  0x55   :  { %2661 = vst [vmem:[#allocation37_spill] sm:$0xff] %v2219_v17  ;;  %2662 = vst [vmem:[#allocation38_spill] sm:$0xff] %v2221_v18  ;;  %v2223_v19 = vld [vmem:[#allocation10 + $0x6c] sm:$0xff]  ;;  %v2225_v20 = vld [vmem:[#allocation10 + $0x74] sm:$0xf] }
  0x56   :  { %v2227_v21 = vld [vmem:[#allocation10 + $0x78] sm:$0xff]  ;;  %v2229_v22 = vld [vmem:[#allocation10 + $0x80] sm:$0xf]  ;;  %v2231_v23 = vld [vmem:[#allocation10 + $0x84] sm:$0xff] }
  0x57   :  { %v2233_v24 = vld [vmem:[#allocation10 + $0x8c] sm:$0xf]  ;;  %v2235_v25 = vld [vmem:[#allocation10 + $0x90] sm:$0xff]  ;;  %v2237_v26 = vld [vmem:[#allocation10 + $0x98] sm:$0xf] }
  0x58   :  { %v2239_v27 = vld [vmem:[#allocation10 + $0x9c] sm:$0xff]  ;;  %v2241_v28 = vld [vmem:[#allocation10 + $0xa4] sm:$0xf]  ;;  %v2243_v29 = vld [vmem:[#allocation10 + $0xa8] sm:$0xff] }
  0x59   :  { %v2245_v30 = vld [vmem:[#allocation10 + $0xb0] sm:$0xf]  ;;  %v2247_v31 = vld [vmem:[#allocation10 + $0xb4] sm:$0xff]  ;;  %v2249_v32 = vld [vmem:[#allocation10 + $0xbc] sm:$0xf] }
  0x5a   :  { %v2254_v33 = vld [vmem:[%s2609_s4] sm:$0x7]  ;;  %v2258_v35 = vld [vmem:[#allocation11 + $0x8] sm:$0xf]  ;;  %v2260_v36 = vld [vmem:[#allocation11 + $0xc] sm:$0xff] }
  0x5b   :  { %2663 = vst [vmem:[#allocation39_spill] sm:$0xff] %v2254_v33  ;;  %v2256_v34 = vld [vmem:[#allocation11] sm:$0xff]  ;;  %v2262_v37 = vld [vmem:[#allocation11 + $0x14] sm:$0xf]  ;;  %v2264_v38 = vld [vmem:[#allocation11 + $0x18] sm:$0xff] }
  0x5c   :  { %v2266_v39 = vld [vmem:[#allocation11 + $0x20] sm:$0xf]  ;;  %v2268_v40 = vld [vmem:[#allocation11 + $0x24] sm:$0xff]  ;;  %v2270_v41 = vld [vmem:[#allocation11 + $0x2c] sm:$0xf] }
  0x5d   :  { %2664 = vst [vmem:[#allocation40_spill] sm:$0xff] %v2266_v39  ;;  %2665 = vst [vmem:[#allocation41_spill] sm:$0xff] %v2270_v41  ;;  %v2272_v42 = vld [vmem:[#allocation11 + $0x30] sm:$0xff]  ;;  %v2274_v43 = vld [vmem:[#allocation11 + $0x38] sm:$0xf] }
  0x5e   :  { %2666 = vst [vmem:[#allocation42_spill] sm:$0xff] %v2272_v42  ;;  %2667 = vst [vmem:[#allocation43_spill] sm:$0xff] %v2274_v43  ;;  %v2276_v44 = vld [vmem:[#allocation11 + $0x3c] sm:$0xff]  ;;  %v2278_v45 = vld [vmem:[#allocation11 + $0x44] sm:$0xf] }
  0x5f   :  { %2668 = vst [vmem:[#allocation44_spill] sm:$0xff] %v2276_v44  ;;  %2669 = vst [vmem:[#allocation45_spill] sm:$0xff] %v2278_v45  ;;  %v2280_v46 = vld [vmem:[#allocation11 + $0x48] sm:$0xff]  ;;  %v2282_v47 = vld [vmem:[#allocation11 + $0x50] sm:$0xf] }
  0x60   :  { %2670 = vst [vmem:[#allocation46_spill] sm:$0xff] %v2280_v46  ;;  %2671 = vst [vmem:[#allocation47_spill] sm:$0xff] %v2282_v47  ;;  %v2284_v48 = vld [vmem:[#allocation11 + $0x54] sm:$0xff]  ;;  %v2286_v49 = vld [vmem:[#allocation11 + $0x5c] sm:$0xf] }
  0x61   :  { %2672 = vst [vmem:[#allocation48_spill] sm:$0xff] %v2284_v48  ;;  %2673 = vst [vmem:[#allocation49_spill] sm:$0xff] %v2286_v49  ;;  %v2288_v50 = vld [vmem:[#allocation11 + $0x60] sm:$0xff]  ;;  %v2290_v51 = vld [vmem:[#allocation11 + $0x68] sm:$0xf] }
  0x62   :  { %2674 = vst [vmem:[#allocation50_spill] sm:$0xff] %v2288_v50  ;;  %2675 = vst [vmem:[#allocation51_spill] sm:$0xff] %v2290_v51  ;;  %v2292_v52 = vld [vmem:[#allocation11 + $0x6c] sm:$0xff]  ;;  %v2294_v53 = vld [vmem:[#allocation11 + $0x74] sm:$0xf] }
  0x63   :  { %2676 = vst [vmem:[#allocation52_spill] sm:$0xff] %v2292_v52  ;;  %2677 = vst [vmem:[#allocation53_spill] sm:$0xff] %v2294_v53  ;;  %v2296_v54 = vld [vmem:[#allocation11 + $0x78] sm:$0xff]  ;;  %v2298_v55 = vld [vmem:[#allocation11 + $0x80] sm:$0xf] }
  0x64   :  { %2678 = vst [vmem:[#allocation54_spill] sm:$0xff] %v2296_v54  ;;  %2679 = vst [vmem:[#allocation55_spill] sm:$0xff] %v2298_v55  ;;  %v2300_v56 = vld [vmem:[#allocation11 + $0x84] sm:$0xff]  ;;  %v2302_v57 = vld [vmem:[#allocation11 + $0x8c] sm:$0xf] }
  0x65   :  { %2680 = vst [vmem:[#allocation56_spill] sm:$0xff] %v2300_v56  ;;  %2681 = vst [vmem:[#allocation57_spill] sm:$0xff] %v2302_v57  ;;  %v2304_v58 = vld [vmem:[#allocation11 + $0x90] sm:$0xff]  ;;  %v2306_v59 = vld [vmem:[#allocation11 + $0x98] sm:$0xf] }
  0x66   :  { %2682 = vst [vmem:[#allocation58_spill] sm:$0xff] %v2304_v58  ;;  %2683 = vst [vmem:[#allocation59_spill] sm:$0xff] %v2306_v59  ;;  %v2308_v60 = vld [vmem:[#allocation11 + $0x9c] sm:$0xff]  ;;  %v2310_v61 = vld [vmem:[#allocation11 + $0xa4] sm:$0xf] }
  0x67   :  { %2684 = vst [vmem:[#allocation60_spill] sm:$0xff] %v2308_v60  ;;  %2685 = vst [vmem:[#allocation61_spill] sm:$0xff] %v2310_v61  ;;  %v2312_v62 = vld [vmem:[#allocation11 + $0xa8] sm:$0xff]  ;;  %v2314_v63 = vld [vmem:[#allocation11 + $0xb0] sm:$0xf] }
  0x68   :  { %2686 = vst [vmem:[#allocation62_spill] sm:$0xff] %v2312_v62  ;;  %2687 = vst [vmem:[#allocation63_spill] sm:$0xff] %v2314_v63  ;;  %v2316_v0 = vld [vmem:[#allocation11 + $0xb4] sm:$0xff]  ;;  %v2318_v33 = vld [vmem:[#allocation11 + $0xbc] sm:$0xf] }
  0x69   :  { %2688 = vst [vmem:[#allocation64_spill] sm:$0xff] %v2316_v0  ;;  %2689 = vst [vmem:[#allocation65_spill] sm:$0xff] %v2318_v33  ;;  %v2323_v55 = vld [vmem:[%s2611_s6] sm:$0x7]  ;;  %v1811_v57 = vld [vmem:[#allocation8 + $0x4] ss:$24 sps:$4 sm:$0xff]  }
  0x6a   :  { %2690 = vst [vmem:[#allocation66_spill] sm:$0xff] %v2323_v55  ;;  %v1813_v58 = vld [vmem:[#allocation8 + $0xc] ss:$24 sps:$4 sm:$0xff]   ;;  %438 = vmatprep.subr.bf16.mxu0 %v1811_v57  ;;  %v1815_v59 = vld [vmem:[#allocation8] ss:$24 sps:$4 sm:$0xff]  }
  0x6b   :  { %v1816_v60 = vld [vmem:[#allocation8 + $0x8] ss:$24 sps:$4 sm:$0xff]   ;;  %511 = vmatprep.subr.bf16.mxu1 %v1813_v58  ;;  %v1817_v61 = vld [vmem:[#allocation8 + $0x34] ss:$24 sps:$4 sm:$0xff]   ;;  %439 = vmatpush1.bf16.msra.mxu0 %v1815_v59  ;;  %v1822_v0 = vld [vmem:[#allocation8 + $0x38] ss:$24 sps:$4 sm:$0xff]  }
  0x6c   :  { %512 = vmatpush1.bf16.msra.mxu1 %v1816_v60  ;;  %v1819_v62 = vld [vmem:[#allocation8 + $0x3c] ss:$24 sps:$4 sm:$0xff]   ;;  %v1821_v63 = vld [vmem:[#allocation8 + $0x30] ss:$24 sps:$4 sm:$0xff]   ;;  %440 = vmatprep.subr.bf16.mxu0 %v1817_v61  ;;  %v1825_v51 = vld [vmem:[#allocation8 + $0x6c] ss:$24 sps:$4 sm:$0xff]  }
  0x6d   :  { %513 = vmatprep.subr.bf16.mxu1 %v1819_v62  ;;  %v1823_v33 = vld [vmem:[#allocation8 + $0x64] ss:$24 sps:$4 sm:$0xff]   ;;  %v1827_v53 = vld [vmem:[#allocation8 + $0x60] ss:$24 sps:$4 sm:$0xff]   ;;  %v1829_v55 = vld [vmem:[#allocation8 + $0x94] ss:$24 sps:$4 sm:$0xff]  }
  0x6e   :  { %v1828_v54 = vld [vmem:[#allocation8 + $0x68] ss:$24 sps:$4 sm:$0xff]   ;;  %v1831_v57 = vld [vmem:[#allocation8 + $0x9c] ss:$24 sps:$4 sm:$0xff]   ;;  %v1834_v58 = vld [vmem:[#allocation8 + $0x98] ss:$24 sps:$4 sm:$0xff]  }
  0x6f   :  { %441 = vmatpush1.bf16.msra.mxu0 %v1821_v63  ;;  %v1833_v56 = vld [vmem:[#allocation8 + $0x90] ss:$24 sps:$4 sm:$0xff]   ;;  %v1835_v59 = vld [vmem:[#allocation8 + $0xc4] ss:$24 sps:$4 sm:$0xff]   ;;  %v1839_v61 = vld [vmem:[#allocation8 + $0xc0] ss:$24 sps:$4 sm:$0xff]  }
  0x70   :  { %514 = vmatpush1.bf16.msra.mxu1 %v1822_v0  ;;  %442 = vmatprep.subr.bf16.mxu0 %v1823_v33  ;;  %v1837_v60 = vld [vmem:[#allocation8 + $0xcc] ss:$24 sps:$4 sm:$0xff]   ;;  %v1840_v62 = vld [vmem:[#allocation8 + $0xc8] ss:$24 sps:$4 sm:$0xff]   ;;  %v1843_v0 = vld [vmem:[#allocation8 + $0xfc] ss:$24 sps:$4 sm:$0xff]  }
  0x71   :  { %515 = vmatprep.subr.bf16.mxu1 %v1825_v51  ;;  %v1841_v47 = vld [vmem:[#allocation8 + $0xf4] ss:$24 sps:$4 sm:$0xff]   ;;  %v1845_v63 = vld [vmem:[#allocation8 + $0xf0] ss:$24 sps:$4 sm:$0xff]   ;;  %v1847_v51 = vld [vmem:[#allocation8 + $0x124] ss:$24 sps:$4 sm:$0xff]  }
  0x72   :  { %v1846_v33 = vld [vmem:[#allocation8 + $0xf8] ss:$24 sps:$4 sm:$0xff]  }
  0x73   :  { %443 = vmatpush1.bf16.msra.mxu0 %v1827_v53  ;;  %v1849_v53 = vld [vmem:[#allocation8 + $0x12c] ss:$24 sps:$4 sm:$0xff]  }
  0x74   :  { %516 = vmatpush1.bf16.msra.mxu1 %v1828_v54  ;;  %444 = vmatprep.subr.bf16.mxu0 %v1829_v55  ;;  %v1851_v54 = vld [vmem:[#allocation8 + $0x120] ss:$24 sps:$4 sm:$0xff]  }
  0x75   :  { %517 = vmatprep.subr.bf16.mxu1 %v1831_v57  ;;  %v1852_v55 = vld [vmem:[#allocation8 + $0x128] ss:$24 sps:$4 sm:$0xff]   ;;  %v1853_v57 = vld [vmem:[#allocation8 + $0x154] ss:$24 sps:$4 sm:$0xff]  }
  0x77   :  { %445 = vmatpush1.bf16.msra.mxu0 %v1833_v56  ;;  %v1855_v56 = vld [vmem:[#allocation8 + $0x15c] ss:$24 sps:$4 sm:$0xff]  }
  0x78   :  { %518 = vmatpush1.bf16.msra.mxu1 %v1834_v58  ;;  %446 = vmatprep.subr.bf16.mxu0 %v1835_v59  ;;  %v1857_v58 = vld [vmem:[#allocation8 + $0x150] ss:$24 sps:$4 sm:$0xff]  }
  0x79   :  { %519 = vmatprep.subr.bf16.mxu1 %v1837_v60  ;;  %v1858_v59 = vld [vmem:[#allocation8 + $0x158] ss:$24 sps:$4 sm:$0xff]   ;;  %v1862_v60 = vld [vmem:[#allocation8 + $0x14] ss:$24 sps:$4 sm:$0xff]  }
  0x7b   :  { %447 = vmatpush1.bf16.msra.mxu0 %v1839_v61  ;;  %v2325_v61 = vld [vmem:[#allocation5] sm:$0xff]  }
  0x7c   :  { %520 = vmatpush1.bf16.msra.mxu1 %v1840_v62  ;;  %448 = vmatprep.subr.bf16.mxu0 %v1841_v47  ;;  %v1860_v47 = vld [vmem:[#allocation8 + $0x10] ss:$24 sps:$4 sm:$0xff]   ;;  %v1865_v62 = vld [vmem:[#allocation8 + $0x44] ss:$24 sps:$4 sm:$0xff]  }
  0x7d   :  { %521 = vmatprep.subr.bf16.mxu1 %v1843_v0  ;;  %v1863_v0 = vld [vmem:[#allocation8 + $0x40] ss:$24 sps:$4 sm:$0xff]  }
  0x7f   :  { %449 = vmatpush1.bf16.msra.mxu0 %v1845_v63  ;;  %v1869_v63 = vld [vmem:[#allocation8 + $0x74] ss:$24 sps:$4 sm:$0xff]  }
  0x80   :  { %522 = vmatpush1.bf16.msra.mxu1 %v1846_v33  ;;  %450 = vmatprep.subr.bf16.mxu0 %v1847_v51  ;;  %v2691_v33 = vmov 0   ;;  %v1866_v51 = vld [vmem:[#allocation5 + $0x8] sm:$0xff]  }
  0x81   :  { %523 = vmatprep.subr.bf16.mxu1 %v1849_v53  ;;  %v1867_v53 = vld [vmem:[#allocation8 + $0x70] ss:$24 sps:$4 sm:$0xff]  }
  0x83   :  { %451 = vmatpush1.bf16.msra.mxu0 %v1851_v54  ;;  %v1872_v54 = vld [vmem:[#allocation8 + $0xa4] ss:$24 sps:$4 sm:$0xff]  }
  0x84   :  { %524 = vmatpush1.bf16.msra.mxu1 %v1852_v55  ;;  %452 = vmatprep.subr.bf16.mxu0 %v1853_v57  ;;  %v1870_v55 = vld [vmem:[#allocation8 + $0xa0] ss:$24 sps:$4 sm:$0xff]   ;;  %v1876_v57 = vld [vmem:[#allocation8 + $0xd4] ss:$24 sps:$4 sm:$0xff]  }
  0x85   :  { %525 = vmatprep.subr.bf16.mxu1 %v1855_v56  ;;  %v1873_v56 = vld [vmem:[#allocation5 + $0x10] sm:$0xff]  }
  0x87   :  { %453 = vmatpush1.bf16.msra.mxu0 %v1857_v58  ;;  %v1874_v58 = vld [vmem:[#allocation8 + $0xd0] ss:$24 sps:$4 sm:$0xff]  }
  0x88   :  { %526 = vmatpush1.bf16.msra.mxu1 %v1858_v59  ;;  %584 = vmatprep.subr.bf16.mxu0 %v1862_v60  ;;  %v1879_v59 = vld [vmem:[#allocation8 + $0x104] ss:$24 sps:$4 sm:$0xff]  }
  0x89   :  { %1755 = vmatprep.subr.bf16.mxu1 %v1862_v60  ;;  %v1877_v60 = vld [vmem:[#allocation8 + $0x100] ss:$24 sps:$4 sm:$0xff]  }
  0x8a   :  { %471 = vmatmul.mubr.bf16.vlgmr.msra.gmra.mrb[0].mxu0 %v2325_v61 }
  0x8b   :  { %544 = vmatmul.mubr.bf16.vlgmr.msra.gmra.mrb[0].mxu1 %v2325_v61  ;;  %585 = vmatpush1.bf16.msra.mxu0 %v1860_v47 }
  0x8c   :  { %1763 = vmatpush1.bf16.msra.mxu1 %v1860_v47  ;;  %586 = vmatprep.subr.bf16.mxu0 %v1865_v62  ;;  %v1883_v47 = vld [vmem:[#allocation8 + $0x134] ss:$24 sps:$4 sm:$0xff]  }
  0x8d   :  { %1756 = vmatprep.subr.bf16.mxu1 %v1865_v62  ;;  %480 = vmatprep.mubr.bf16.mxu0 %v2691_v33  ;;  %v1880_v62 = vld [vmem:[#allocation5 + $0x18] sm:$0xff]  }
  0x8e   :  { %553 = vmatprep.mubr.bf16.mxu1 %v2691_v33 }
  0x8f   :  { %587 = vmatpush1.bf16.msra.mxu0 %v1863_v0 }
  0x90   :  { %1764 = vmatpush1.bf16.msra.mxu1 %v1863_v0  ;;  %588 = vmatprep.subr.bf16.mxu0 %v1869_v63  ;;  %v1881_v0 = vld [vmem:[#allocation8 + $0x130] ss:$24 sps:$4 sm:$0xff]  }
  0x91   :  { %1757 = vmatprep.subr.bf16.mxu1 %v1869_v63  ;;  %v1886_v63 = vld [vmem:[#allocation8 + $0x164] ss:$24 sps:$4 sm:$0xff]  }
  0x92   :  { %481 = vmatmul.mubr.bf16.gmra.mrb[4].mxu0 %v1866_v51 }
  0x93   :  { %554 = vmatmul.mubr.bf16.gmra.mrb[4].mxu1 %v1866_v51  ;;  %589 = vmatpush1.bf16.msra.mxu0 %v1867_v53 }
  0x94   :  { %1765 = vmatpush1.bf16.msra.mxu1 %v1867_v53  ;;  %590 = vmatprep.subr.bf16.mxu0 %v1872_v54  ;;  %v1884_v53 = vld [vmem:[#allocation8 + $0x160] ss:$24 sps:$4 sm:$0xff]  }
  0x95   :  { %1758 = vmatprep.subr.bf16.mxu1 %v1872_v54  ;;  %490 = vmatprep.mubr.bf16.mxu0 %v2691_v33  ;;  %v144_v54 = vlaneseq }
  0x96   :  { %563 = vmatprep.mubr.bf16.mxu1 %v2691_v33 }
  0x97   :  { %591 = vmatpush1.bf16.msra.mxu0 %v1870_v55 }
  0x98   :  { %1766 = vmatpush1.bf16.msra.mxu1 %v1870_v55  ;;  %592 = vmatprep.subr.bf16.mxu0 %v1876_v57  ;;  %v2340_v55 = vshrl.u32 %v144_v54, 7 }
  0x99   :  { %1759 = vmatprep.subr.bf16.mxu1 %v1876_v57 }
  0x9a   :  { %491 = vmatmul.mubr.bf16.gmra.mrb[8].mxu0 %v1873_v56  ;;  %v2343_v57 = vsub.s32 0, %v2340_v55 }
  0x9b   :  { %564 = vmatmul.mubr.bf16.gmra.mrb[8].mxu1 %v1873_v56  ;;  %593 = vmatpush1.bf16.msra.mxu0 %v1874_v58 }
  0x9c   :  { %1767 = vmatpush1.bf16.msra.mxu1 %v1874_v58  ;;  %594 = vmatprep.subr.bf16.mxu0 %v1879_v59  ;;  %2692 = vst [vmem:[#allocation67_spill] sm:$0xff] %v2343_v57  ;;  %v2346_v58 = vsub.s32 2, %v2340_v55 }
  0x9d   :  { %1760 = vmatprep.subr.bf16.mxu1 %v1879_v59  ;;  %500 = vmatprep.mubr.bf16.mxu0 %v2691_v33 }
  0x9e   :  { %573 = vmatprep.mubr.bf16.mxu1 %v2691_v33  ;;  %2693 = vst [vmem:[#allocation68_spill] sm:$0xff] %v2346_v58 }
  0x9f   :  { %595 = vmatpush1.bf16.msra.mxu0 %v1877_v60 }
  0xa0   :  { %1768 = vmatpush1.bf16.msra.mxu1 %v1877_v60  ;;  %596 = vmatprep.subr.bf16.mxu0 %v1883_v47 }
  0xa1   :  { %1761 = vmatprep.subr.bf16.mxu1 %v1883_v47 }
  0xa2   :  { %501 = vmatmul.mubr.bf16.gmra.mrb[12].mxu0 %v1880_v62 }
  0xa3   :  { %574 = vmatmul.mubr.bf16.gmra.mrb[12].mxu1 %v1880_v62  ;;  %597 = vmatpush1.bf16.msra.mxu0 %v1881_v0 }
  0xa4   :  { %1769 = vmatpush1.bf16.msra.mxu1 %v1881_v0  ;;  %598 = vmatprep.subr.bf16.mxu0 %v1886_v63 }
  0xa5   :  { %1762 = vmatprep.subr.bf16.mxu1 %v1886_v63  ;;  %616 = vmatprep.mubr.bf16.mxu0 %v2691_v33 }
  0xa6   :  { %636 = vmatprep.mubr.bf16.mxu1 %v2691_v33 }
  0xa7   :  { %599 = vmatpush1.bf16.msra.mxu0 %v1884_v53 }
  0xa8   :  { %1770 = vmatpush1.bf16.msra.mxu1 %v1884_v53 }
  0xaa   :  { %617 = vmatmul.mubr.bf16.vlgmr.msra.gmra.mrb[16].mxu0 %v2325_v61  ;;  %v2351_v61 = vld [vmem:[%s2607_s2] sm:$0x3f]  ;;  %s2412_s2 = smov 0  }
  0xab   :  { %637 = vmatmul.mubr.bf16.vlgmr.msra.gmra.mrb[16].mxu1 %v1873_v56  ;;  %626 = vmatprep.mubr.bf16.mxu0 %v2691_v33  ;;  %v2354_v56 = vsub.s32 1, %v2340_v55  ;;  %v2363_v59 = vrot.slane %v2351_v61, %v2346_v58 }
  0xac   :  { %646 = vmatprep.mubr.bf16.mxu1 %v2691_v33  ;;  %v158_v33 = vsub.s32 3, %v2340_v55 }
  0xad   :  { %2694 = vst [vmem:[#allocation69_spill] sm:$0xff] %v2354_v56  ;;  %v2367_v60 = vrot.slane %v2351_v61, %v2354_v56 }
  0xae   :  { %v2370_v47 = vrot.slane %v2351_v61, %v158_v33 }
  0xb2   :  { %627 = vmatmul.mubr.bf16.gmra.mrb[20].mxu0 %v1866_v51  ;;  %v2359_v51 = vrot.slane %v2351_v61, %v2343_v57 }
  0xb3   :  { %647 = vmatmul.mubr.bf16.gmra.mrb[20].mxu1 %v1880_v62 }
 0x15d   :  { %v472_v62 = vpop.f32.mrb[0].mxu0 }
 0x15e   :  { %v545_v0 = vpop.f32.mrb[0].mxu1  ;;  %v473_v63 = vadd.f32 %v472_v62, %v2359_v51  ;;  %v474_v54 = vpop.f32.mrb[1].mxu0 }
 0x15f   :  { %v546_v53 = vadd.f32 %v545_v0, %v2363_v59  ;;  %v547_v57 = vpop.f32.mrb[1].mxu1  ;;  %v475_v49 = vadd.f32 %v474_v54, %v2367_v60  ;;  %v476_v50 = vpop.f32.mrb[2].mxu0 }
 0x160   :  { %v548_v58 = vadd.f32 %v547_v57, %v2370_v47  ;;  %v549_v52 = vpop.f32.mrb[2].mxu1  ;;  %v477_v56 = vadd.f32 %v476_v50, %v2359_v51  ;;  %v478_v33 = vpop.f32.mrb[3].mxu0 }
 0x161   :  { %v550_v43 = vadd.f32 %v549_v52, %v2363_v59  ;;  %v551_v45 = vpop.f32.mrb[3].mxu1  ;;  %v1648_v46 = vpack.c.bf16 %v475_v49, %v473_v63  ;;  %v479_v62 = vadd.f32 %v478_v33, %v2367_v60 }
 0x162   :  { %v1649_v48 = vpack.c.bf16 %v548_v58, %v546_v53  ;;  %v552_v0 = vadd.f32 %v551_v45, %v2370_v47 }
 0x163   :  { %801 = vst [vmem:[#allocation2] sm:$0xff] %v1648_v46  ;;  %v1651_v39 = vpack.c.bf16 %v479_v62, %v477_v56 }
 0x164   :  { %802 = vst [vmem:[#allocation2 + $0x8] sm:$0xff] %v1649_v48  ;;  %v1652_v54 = vpack.c.bf16 %v552_v0, %v550_v43 }
 0x165   :  { %804 = vst [vmem:[#allocation2 + $0x18] sm:$0xff] %v1651_v39  ;;  %v482_v57 = vpop.f32.mrb[4].mxu0 }
 0x166   :  { %805 = vst [vmem:[#allocation2 + $0x20] sm:$0xff] %v1652_v54  ;;  %v555_v41 = vpop.f32.mrb[4].mxu1  ;;  %v483_v50 = vadd.f32 %v482_v57, %v2359_v51  ;;  %v484_v42 = vpop.f32.mrb[5].mxu0 }
 0x167   :  { %v556_v52 = vadd.f32 %v555_v41, %v2363_v59  ;;  %v557_v44 = vpop.f32.mrb[5].mxu1  ;;  %v485_v49 = vadd.f32 %v484_v42, %v2367_v60  ;;  %v486_v63 = vpop.f32.mrb[6].mxu0 }
 0x168   :  { %v558_v58 = vadd.f32 %v557_v44, %v2370_v47  ;;  %v559_v45 = vpop.f32.mrb[6].mxu1  ;;  %v487_v46 = vadd.f32 %v486_v63, %v2359_v51  ;;  %v488_v39 = vpop.f32.mrb[7].mxu0 }
 0x169   :  { %v560_v43 = vadd.f32 %v559_v45, %v2363_v59  ;;  %v561_v48 = vpop.f32.mrb[7].mxu1  ;;  %v1654_v56 = vpack.c.bf16 %v485_v49, %v483_v50  ;;  %v489_v33 = vadd.f32 %v488_v39, %v2367_v60 }
 0x16a   :  { %v1655_v53 = vpack.c.bf16 %v558_v58, %v556_v52  ;;  %v562_v41 = vadd.f32 %v561_v48, %v2370_v47 }
 0x16b   :  { %807 = vst [vmem:[#allocation2 + $0x30] sm:$0xff] %v1654_v56  ;;  %v1657_v62 = vpack.c.bf16 %v489_v33, %v487_v46 }
 0x16c   :  { %808 = vst [vmem:[#allocation2 + $0x38] sm:$0xff] %v1655_v53  ;;  %v1658_v42 = vpack.c.bf16 %v562_v41, %v560_v43 }
 0x16d   :  { %810 = vst [vmem:[#allocation2 + $0x48] sm:$0xff] %v1657_v62  ;;  %v492_v44 = vpop.f32.mrb[8].mxu0 }
 0x16e   :  { %811 = vst [vmem:[#allocation2 + $0x50] sm:$0xff] %v1658_v42  ;;  %v565_v0 = vpop.f32.mrb[8].mxu1  ;;  %v493_v54 = vadd.f32 %v492_v44, %v2359_v51  ;;  %v494_v63 = vpop.f32.mrb[9].mxu0 }
 0x16f   :  { %v566_v57 = vadd.f32 %v565_v0, %v2363_v59  ;;  %v567_v45 = vpop.f32.mrb[9].mxu1  ;;  %v495_v50 = vadd.f32 %v494_v63, %v2367_v60  ;;  %v496_v49 = vpop.f32.mrb[10].mxu0 }
 0x170   :  { %v568_v52 = vadd.f32 %v567_v45, %v2370_v47  ;;  %v569_v58 = vpop.f32.mrb[10].mxu1  ;;  %v497_v39 = vadd.f32 %v496_v49, %v2359_v51  ;;  %v498_v43 = vpop.f32.mrb[11].mxu0 }
 0x171   :  { %v570_v46 = vadd.f32 %v569_v58, %v2363_v59  ;;  %v571_v48 = vpop.f32.mrb[11].mxu1  ;;  %v1660_v56 = vpack.c.bf16 %v495_v50, %v493_v54  ;;  %v499_v33 = vadd.f32 %v498_v43, %v2367_v60  ;;  %v162_v54 = vsub.s32 4, %v2340_v55 }
 0x172   :  { %v1661_v53 = vpack.c.bf16 %v568_v52, %v566_v57  ;;  %v572_v41 = vadd.f32 %v571_v48, %v2370_v47 }
 0x173   :  { %813 = vst [vmem:[#allocation2 + $0x60] sm:$0xff] %v1660_v56  ;;  %v1663_v62 = vpack.c.bf16 %v499_v33, %v497_v39  ;;  %v166_v39 = vsub.s32 5, %v2340_v55 }
 0x174   :  { %814 = vst [vmem:[#allocation2 + $0x68] sm:$0xff] %v1661_v53  ;;  %v1664_v42 = vpack.c.bf16 %v572_v41, %v570_v46 }
 0x175   :  { %816 = vst [vmem:[#allocation2 + $0x78] sm:$0xff] %v1663_v62  ;;  %v502_v44 = vpop.f32.mrb[12].mxu0  ;;  %v167_v55 = vrot.slane %v2351_v61, %v166_v39 }
 0x176   :  { %817 = vst [vmem:[#allocation2 + $0x80] sm:$0xff] %v1664_v42  ;;  %v575_v0 = vpop.f32.mrb[12].mxu1  ;;  %v503_v63 = vadd.f32 %v502_v44, %v2359_v51  ;;  %v504_v49 = vpop.f32.mrb[13].mxu0  ;;  %v163_v44 = vrot.slane %v2351_v61, %v162_v54 }
 0x177   :  { %v576_v45 = vadd.f32 %v575_v0, %v2363_v59  ;;  %v577_v58 = vpop.f32.mrb[13].mxu1  ;;  %v505_v57 = vadd.f32 %v504_v49, %v2367_v60  ;;  %v506_v52 = vpop.f32.mrb[14].mxu0 }
 0x178   :  { %v578_v50 = vadd.f32 %v577_v58, %v2370_v47  ;;  %v579_v43 = vpop.f32.mrb[14].mxu1  ;;  %v507_v46 = vadd.f32 %v506_v52, %v2359_v51  ;;  %v508_v56 = vpop.f32.mrb[15].mxu0 }
 0x179   :  { %v580_v48 = vadd.f32 %v579_v43, %v2363_v59  ;;  %v581_v53 = vpop.f32.mrb[15].mxu1  ;;  %v1666_v33 = vpack.c.bf16 %v505_v57, %v503_v63  ;;  %v509_v62 = vadd.f32 %v508_v56, %v2367_v60 }
 0x17a   :  { %v1667_v41 = vpack.c.bf16 %v578_v50, %v576_v45  ;;  %v582_v42 = vadd.f32 %v581_v53, %v2370_v47 }
 0x17b   :  { %819 = vst [vmem:[#allocation2 + $0x90] sm:$0xff] %v1666_v33  ;;  %v1669_v0 = vpack.c.bf16 %v509_v62, %v507_v46 }
 0x17c   :  { %820 = vst [vmem:[#allocation2 + $0x98] sm:$0xff] %v1667_v41  ;;  %v1670_v49 = vpack.c.bf16 %v582_v42, %v580_v48 }
 0x17d   :  { %822 = vst [vmem:[#allocation2 + $0xa8] sm:$0xff] %v1669_v0  ;;  %v618_v51 = vpop.f32.mrb[16].mxu0 }
 0x17e   :  { %823 = vst [vmem:[#allocation2 + $0xb0] sm:$0xff] %v1670_v49  ;;  %v638_v59 = vpop.f32.mrb[16].mxu1  ;;  %v619_v58 = vadd.f32 %v618_v51, %v163_v44  ;;  %v620_v63 = vpop.f32.mrb[17].mxu0 }
 0x17f   :  { %v639_v52 = vadd.f32 %v638_v59, %v163_v44  ;;  %v640_v45 = vpop.f32.mrb[17].mxu1  ;;  %v621_v57 = vadd.f32 %v620_v63, %v167_v55  ;;  %v622_v50 = vpop.f32.mrb[18].mxu0 }
 0x180   :  { %v641_v60 = vadd.f32 %v640_v45, %v167_v55  ;;  %v642_v47 = vpop.f32.mrb[18].mxu1  ;;  %v623_v43 = vadd.f32 %v622_v50, %v163_v44  ;;  %v624_v56 = vpop.f32.mrb[19].mxu0 }
 0x181   :  { %v643_v54 = vadd.f32 %v642_v47, %v163_v44  ;;  %v644_v53 = vpop.f32.mrb[19].mxu1  ;;  %v1650_v46 = vpack.c.bf16 %v621_v57, %v619_v58  ;;  %v625_v33 = vadd.f32 %v624_v56, %v167_v55 }
 0x182   :  { %v1662_v48 = vpack.c.bf16 %v641_v60, %v639_v52  ;;  %v645_v61 = vadd.f32 %v644_v53, %v167_v55 }
 0x183   :  { %803 = vst [vmem:[#allocation2 + $0x10] sm:$0xff] %v1650_v46  ;;  %v1653_v39 = vpack.c.bf16 %v625_v33, %v623_v43  ;;  %v2408_v33 = vmov 0.0  }
 0x184   :  { %815 = vst [vmem:[#allocation2 + $0x70] sm:$0xff] %v1662_v48  ;;  %v1665_v41 = vpack.c.bf16 %v645_v61, %v643_v54  ;;  %v2410_v61 = vmov 0.0  }
 0x185   :  { %806 = vst [vmem:[#allocation2 + $0x28] sm:$0xff] %v1653_v39  ;;  %v628_v62 = vpop.f32.mrb[20].mxu0 }
 0x186   :  { %818 = vst [vmem:[#allocation2 + $0x88] sm:$0xff] %v1665_v41  ;;  %v648_v42 = vpop.f32.mrb[20].mxu1  ;;  %v629_v0 = vadd.f32 %v628_v62, %v163_v44  ;;  %v630_v51 = vpop.f32.mrb[21].mxu0 }
 0x187   :  { %v649_v49 = vadd.f32 %v648_v42, %v163_v44  ;;  %v650_v59 = vpop.f32.mrb[21].mxu1  ;;  %v631_v63 = vadd.f32 %v630_v51, %v167_v55  ;;  %v632_v50 = vpop.f32.mrb[22].mxu0 }
 0x188   :  { %v651_v45 = vadd.f32 %v650_v59, %v167_v55  ;;  %v652_v47 = vpop.f32.mrb[22].mxu1  ;;  %v633_v58 = vadd.f32 %v632_v50, %v163_v44  ;;  %v634_v57 = vpop.f32.mrb[23].mxu0 }
 0x189   :  { %v653_v52 = vadd.f32 %v652_v47, %v163_v44  ;;  %v654_v60 = vpop.f32.mrb[23].mxu1  ;;  %v1656_v56 = vpack.c.bf16 %v631_v63, %v629_v0  ;;  %v635_v43 = vadd.f32 %v634_v57, %v167_v55 }
 0x18a   :  { %v1668_v53 = vpack.c.bf16 %v651_v45, %v649_v49  ;;  %v655_v54 = vadd.f32 %v654_v60, %v167_v55 }
 0x18b   :  { %809 = vst [vmem:[#allocation2 + $0x40] sm:$0xff] %v1656_v56  ;;  %v1659_v46 = vpack.c.bf16 %v635_v43, %v633_v58 }
 0x18c   :  { %821 = vst [vmem:[#allocation2 + $0xa0] sm:$0xff] %v1668_v53  ;;  %v1671_v48 = vpack.c.bf16 %v655_v54, %v653_v52 }
 0x18d   :  { %812 = vst [vmem:[#allocation2 + $0x58] sm:$0xff] %v1659_v46 }
 0x18e   :  { %824 = vst [vmem:[#allocation2 + $0xb8] sm:$0xff] %v1671_v48 }
 0x18f LB: > { %v2695_v17 = vld [vmem:[#allocation37_spill] sm:$0xff]  ;;  %v2696_v15 = vld [vmem:[#allocation35_spill] sm:$0xff]  ;;  %v2704_v4 = vld [vmem:[#allocation24_spill] sm:$0xff]  ;;  %v2084_v0 = vmov 0.0   ;;  %v2085_v51 = vmov 0   ;;  %vm2086_vm0 = vmmov 0   ;;  %v1609_v57 = vcombine.high %v2227_v21, %v2231_v23  ;;  %s2071_s2 = sphi %s2412_s2, %s896_s2   ;;  %v2067_v61 = vphi %v2410_v61, %v2745_v61   ;;  %v2063_v33 = vphi %v2408_v33, %v2744_v33  }
 0x190   : > { %v2697_v13 = vld [vmem:[#allocation33_spill] sm:$0xff]  ;;  %v2698_v11 = vld [vmem:[#allocation31_spill] sm:$0xff]  ;;  %v2705_v2 = vld [vmem:[#allocation22_spill] sm:$0xff]  ;;  %1715 = vmatprep.subr.bf16.mxu1 %v2084_v0  ;;  %1082 = vmatprep.mubr.bf16.mxu0 %v2085_v51  ;;  %v1606_v47 = vcombine.high %v2695_v17, %v2223_v19  ;;  %v1605_v52 = vcombine.low %v2695_v17, %v2223_v19  ;;  %v1608_v56 = vcombine.low %v2227_v21, %v2231_v23  ;;  %s1672_s16 = smul.u32 24, %s2071_s2  ;;  %s899_s18 = ssub.s32 7, %s2071_s2 }
 0x191   : > { %v2699_v9 = vld [vmem:[#allocation29_spill] sm:$0xff]  ;;  %v2700_v7 = vld [vmem:[#allocation27_spill] sm:$0xff]  ;;  %v1595_v62 = vcombine.low %v2705_v2, %v2704_v4  ;;  %v2706_v8 = vld [vmem:[#allocation28_spill] sm:$0xff]  ;;  %v1603_v63 = vcombine.high %v2697_v13, %v2696_v15  ;;  %v1602_v50 = vcombine.low %v2697_v13, %v2696_v15  ;;  %1731 = vmatprep.mubr.msk.bf16.mxu1 %vm2086_vm0, %v2084_v0  ;;  %v1612_v53 = vcombine.high %v2235_v25, %v2239_v27  ;;  %s2551_s19 = smul.u32 24, %s899_s18  ;;  %s1646_s20 = sshll.u32 %s2071_s2, 3 }
 0x192   : > { %v2701_v5 = vld [vmem:[#allocation25_spill] sm:$0xff]  ;;  %v2702_v3 = vld [vmem:[#allocation23_spill] sm:$0xff]  ;;  %v1600_v42 = vcombine.high %v2699_v9, %v2698_v11  ;;  %v2707_v6 = vld [vmem:[#allocation26_spill] sm:$0xff]  ;;  %v1599_v59 = vcombine.low %v2699_v9, %v2698_v11  ;;  %v1610_v43 = vcombine.low %v2229_v22, %v2233_v24  ;;  %v1611_v54 = vcombine.low %v2235_v25, %v2239_v27  ;;  %s902_s17 = scalar_lea.vmem [#allocation2], %s1672_s16  ;;  %s1417_s21 = scalar_lea.vmem [#allocation3], %s1646_s20 }
 0x193   : > { %v2703_v1 = vld [vmem:[#allocation21_spill] sm:$0xff]  ;;  %v1597_v39 = vcombine.high %v2701_v5, %v2700_v7  ;;  %v1596_v41 = vcombine.low %v2701_v5, %v2700_v7  ;;  %1716 = vmatpush3.bf16.msra.mxu1 %v1595_v62  ;;  %v1598_v49 = vcombine.low %v2707_v6, %v2706_v8  ;;  %v2708_v12 = vld [vmem:[#allocation32_spill] sm:$0xff]  ;;  %v2709_v10 = vld [vmem:[#allocation30_spill] sm:$0xff]  ;;  %v1615_v46 = vcombine.high %v2243_v29, %v2247_v31  ;;  %s1160_s0 = scalar_lea.vmem [#allocation2], %s2551_s19  ;;  %s1647_s22 = sshll.u32 %s899_s18, 3 }
 0x194   : > { %v1594_v44 = vcombine.high %v2703_v1, %v2702_v3  ;;  %v1593_v55 = vcombine.low %v2703_v1, %v2702_v3  ;;  %1717 = vmatprep.subr.bf16.mxu1 %v2084_v0  ;;  %v1601_v45 = vcombine.low %v2709_v10, %v2708_v12  ;;  %v2710_v16 = vld [vmem:[#allocation36_spill] sm:$0xff]  ;;  %v2711_v14 = vld [vmem:[#allocation34_spill] sm:$0xff]  ;;  %v1613_v48 = vcombine.low %v2237_v26, %v2241_v28  ;;  %s1420_s23 = scalar_lea.vmem [#allocation4], %s1647_s22  ;;  %s896_s2 = sadd.s32 1, %s2071_s2  }
 0x195   : > { %v1604_v58 = vcombine.low %v2711_v14, %v2710_v16  ;;  %v2712_v18 = vld [vmem:[#allocation38_spill] sm:$0xff]  ;;  %v1620_v62 = vcombine.low %v2256_v34, %v2260_v36  ;;  %p893_p4 = scmp.ge.s32.totalorder %s896_s2, 8  }
 0x196   : > { %1050 = vmatprep.subr.bf16.mxu0 %v1594_v44  ;;  %v1607_v60 = vcombine.low %v2712_v18, %v2225_v20  ;;  %v1614_v44 = vcombine.low %v2243_v29, %v2247_v31  ;;  %s2087_s24 = smov (%p893_p4), [#allocation14]  }
 0x197   : > { %1051 = vmatpush1.bf16.msra.mxu0 %v1593_v55  ;;  %1718 = vmatpush3.bf16.msra.mxu1 %v1598_v49  ;;  %v1621_v55 = vcombine.high %v2256_v34, %v2260_v36  ;;  %v1622_v49 = vcombine.low %v2258_v35, %v2262_v37  ;;  %s1482_s25 = sshll.u32 (%p893_p4), %s2087_s24, 4  ;;  %s1483_s25 = int_to_ptr.vmem [resolvable:$true] %s1482_s25 }
 0x198   : > { %1052 = vmatprep.subr.bf16.mxu0 %v1597_v39  ;;  %1719 = vmatprep.subr.bf16.mxu1 %v2084_v0  ;;  %v1616_v39 = vcombine.low %v2245_v30, %v2249_v32  ;;  %s1995_s26 = scalar_lea.vmem (%p893_p4), %s1483_s25, 128  ;;  %p2000_p6 = scmp.lt.s32.totalorder (%p893_p4), %s1483_s25, %s1483_s25 }
 0x199   :  { %p1996_p5 = scmp.ne.s32.totalorder (%p893_p4), %s1483_s25, %s1995_s26  ;;  %p2001_p7 = scmp.lt.s32.totalorder (%p893_p4), %s1995_s26, %s1995_s26 }
 0x19b   : > { %1053 = vmatpush1.bf16.msra.mxu0 %v1596_v41  ;;  %1720 = vmatpush3.bf16.msra.mxu1 %v1601_v45  ;;  %v905_v41 = vpack.c.bf16 %v2067_v61, %v2067_v61  ;;  %v2714_v45 = vld [vmem:[#allocation42_spill] sm:$0xff]  ;;  %p2002_p8 = por (%p893_p4), %p2001_p7, %p2000_p6 }
 0x19c   : > { %1054 = vmatprep.subr.bf16.mxu0 %v1600_v42  ;;  %1721 = vmatprep.subr.bf16.mxu1 %v2084_v0  ;;  %v1624_v42 = vcombine.high %v2264_v38, %v2268_v40 }
 0x19d   :  { %p2003_p9 = pnand (%p893_p4), %p2002_p8, %p1996_p5 }
 0x19f   : > { %1055 = vmatpush1.bf16.msra.mxu0 %v1599_v59  ;;  %1722 = vmatpush3.bf16.msra.mxu1 %v1604_v58  ;;  %v1623_v59 = vcombine.low %v2264_v38, %v2268_v40  ;;  %v2716_v58 = vld [vmem:[#allocation40_spill] sm:$0xff] }
 0x1a0   : > { %1056 = vmatprep.subr.bf16.mxu0 %v1603_v63  ;;  %1723 = vmatprep.subr.bf16.mxu1 %v2084_v0  ;;  %v2713_v63 = vld [vmem:[#allocation44_spill] sm:$0xff] }
 0x1a3   : > { %1057 = vmatpush1.bf16.msra.mxu0 %v1602_v50  ;;  %1724 = vmatpush3.bf16.msra.mxu1 %v1607_v60  ;;  %v1627_v50 = vcombine.high %v2714_v45, %v2713_v63  ;;  %v2718_v60 = vld [vmem:[#allocation46_spill] sm:$0xff] }
 0x1a4   : > { %1058 = vmatprep.subr.bf16.mxu0 %v1606_v47  ;;  %1725 = vmatprep.subr.bf16.mxu1 %v2084_v0  ;;  %v2715_v47 = vld [vmem:[#allocation41_spill] sm:$0xff] }
 0x1a7   : > { %1059 = vmatpush1.bf16.msra.mxu0 %v1605_v52  ;;  %1726 = vmatpush3.bf16.msra.mxu1 %v1610_v43  ;;  %v1625_v52 = vcombine.low %v2716_v58, %v2715_v47  ;;  %v2720_v43 = vld [vmem:[#allocation43_spill] sm:$0xff]  ;;  %v2727_v47 = vld [vmem:[#allocation53_spill] sm:$0xff] }
 0x1a8   : > { %1060 = vmatprep.subr.bf16.mxu0 %v1609_v57  ;;  %1727 = vmatprep.subr.bf16.mxu1 %v2084_v0  ;;  %v1626_v57 = vcombine.low %v2714_v45, %v2713_v63  ;;  %v2728_v58 = vld [vmem:[#allocation51_spill] sm:$0xff] }
 0x1ab   : > { %1061 = vmatpush1.bf16.msra.mxu0 %v1608_v56  ;;  %1728 = vmatpush3.bf16.msra.mxu1 %v1613_v48  ;;  %v2721_v48 = vld [vmem:[#allocation52_spill] sm:$0xff] }
 0x1ac   : > { %1062 = vmatprep.subr.bf16.mxu0 %v1612_v53  ;;  %1729 = vmatprep.subr.bf16.mxu1 %v2084_v0  ;;  %v2719_v53 = vld [vmem:[#allocation45_spill] sm:$0xff] }
 0x1af   : > { %1063 = vmatpush1.bf16.msra.mxu0 %v1611_v54  ;;  %1730 = vmatpush3.bf16.msra.mxu1 %v1616_v39  ;;  %v1628_v54 = vcombine.low %v2720_v43, %v2719_v53  ;;  %v2723_v39 = vld [vmem:[#allocation49_spill] sm:$0xff]  ;;  %v2730_v53 = vld [vmem:[#allocation58_spill] sm:$0xff] }
 0x1b0   : > { %1064 = vmatprep.subr.bf16.mxu0 %v1615_v46  ;;  %1735 = vmatprep.subr.bf16.mxu1 %v2084_v0 }
 0x1b2   : > { %1732 = vmatmul.mubr.bf16.vlgmr.msra.gmra.mrb[0].mxu1 %v905_v41 }
 0x1b3   : > { %1065 = vmatpush1.bf16.msra.mxu0 %v1614_v44  ;;  %1736 = vmatpush3.bf16.msra.mxu1 %v1622_v49  ;;  %v2722_v44 = vld [vmem:[#allocation50_spill] sm:$0xff]  ;;  %v2725_v49 = vld [vmem:[#allocation56_spill] sm:$0xff] }
 0x1b4   : > { %1308 = vmatprep.subr.bf16.mxu0 %v1621_v55  ;;  %1751 = vmatprep.mubr.msk.bf16.mxu1 %vm2086_vm0, %v2084_v0  ;;  %v1633_v55 = vcombine.high %v2722_v44, %v2721_v48 }
 0x1b5   : > { %1737 = vmatprep.subr.bf16.mxu1 %v2084_v0 }
 0x1b6   : > { %1083 = vmatmul.mubr.bf16.vlgmr.msra.gmra.mrb[0].mxu0 %v905_v41  ;;  %v2724_v41 = vld [vmem:[#allocation47_spill] sm:$0xff] }
 0x1b7   : > { %1309 = vmatpush1.bf16.msra.mxu0 %v1620_v62  ;;  %1340 = vmatprep.mubr.bf16.mxu0 %v2085_v51  ;;  %v2717_v51 = vld [vmem:[#allocation48_spill] sm:$0xff]  ;;  %v1631_v62 = vcombine.low %v2724_v41, %v2723_v39 }
 0x1b8   : > { %1310 = vmatprep.subr.bf16.mxu0 %v1624_v42  ;;  %v1630_v56 = vcombine.high %v2718_v60, %v2717_v51  ;;  %1738 = vmatpush3.bf16.msra.mxu1 %v1625_v52  ;;  %v1629_v46 = vcombine.low %v2718_v60, %v2717_v51  ;;  %v1632_v42 = vcombine.low %v2722_v44, %v2721_v48  ;;  %v2733_v41 = vld [vmem:[#allocation64_spill] sm:$0xff] }
 0x1b9   : > { %1739 = vmatprep.subr.bf16.mxu1 %v2084_v0  ;;  %v1634_v52 = vcombine.low %v2728_v58, %v2727_v47  ;;  %v2736_v47 = vld [vmem:[#allocation59_spill] sm:$0xff] }
 0x1bb   : > { %1311 = vmatpush1.bf16.msra.mxu0 %v1623_v59  ;;  %v2726_v59 = vld [vmem:[#allocation54_spill] sm:$0xff] }
 0x1bc   : > { %1312 = vmatprep.subr.bf16.mxu0 %v1627_v50  ;;  %1740 = vmatpush3.bf16.msra.mxu1 %v1628_v54  ;;  %v1636_v50 = vcombine.high %v2726_v59, %v2725_v49  ;;  %v2731_v54 = vld [vmem:[#allocation57_spill] sm:$0xff] }
 0x1bd   : > { %1741 = vmatprep.subr.bf16.mxu1 %v2084_v0 }
 0x1bf   : > { %1313 = vmatpush1.bf16.msra.mxu0 %v1626_v57  ;;  %v1635_v57 = vcombine.low %v2726_v59, %v2725_v49 }
 0x1c0   : > { %1314 = vmatprep.subr.bf16.mxu0 %v1630_v56  ;;  %1742 = vmatpush3.bf16.msra.mxu1 %v1631_v62  ;;  %v2729_v56 = vld [vmem:[#allocation60_spill] sm:$0xff]  ;;  %v2734_v62 = vld [vmem:[#allocation62_spill] sm:$0xff] }
 0x1c1   : > { %1743 = vmatprep.subr.bf16.mxu1 %v2084_v0  ;;  %v1639_v43 = vcombine.high %v2730_v53, %v2729_v56  ;;  %v1638_v39 = vcombine.low %v2730_v53, %v2729_v56 }
 0x1c3   : > { %1315 = vmatpush1.bf16.msra.mxu0 %v1629_v46  ;;  %v2732_v46 = vld [vmem:[#allocation55_spill] sm:$0xff] }
 0x1c4   : > { %1316 = vmatprep.subr.bf16.mxu0 %v1633_v55  ;;  %1744 = vmatpush3.bf16.msra.mxu1 %v1634_v52  ;;  %v1637_v55 = vcombine.low %v2732_v46, %v2731_v54  ;;  %v1641_v52 = vcombine.low %v2734_v62, %v2733_v41  ;;  %v2738_v54 = vld [vmem:[#allocation63_spill] sm:$0xff] }
 0x1c5   : > { %1745 = vmatprep.subr.bf16.mxu1 %v2084_v0 }
 0x1c7   : > { %1317 = vmatpush1.bf16.msra.mxu0 %v1632_v42  ;;  %v1642_v42 = vcombine.high %v2734_v62, %v2733_v41 }
 0x1c8   : > { %1318 = vmatprep.subr.bf16.mxu0 %v1636_v50  ;;  %1746 = vmatpush3.bf16.msra.mxu1 %v1637_v55  ;;  %v2735_v50 = vld [vmem:[#allocation61_spill] sm:$0xff]  ;;  %v903_v55 = vld [vmem:[%s902_s17] sm:$0xff] }
 0x1c9   : > { %v1640_v58 = vcombine.low %v2736_v47, %v2735_v50  ;;  %1747 = vmatprep.subr.bf16.mxu1 %v2084_v0  ;;  %v2740_v50 = vld [vmem:[#allocation39_spill] sm:$0xff]  ;;  %v1140_v1 = vrot.slane %v903_v55, 4 }
 0x1cb   : > { %1319 = vmatpush1.bf16.msra.mxu0 %v1635_v57  ;;  %v2737_v57 = vld [vmem:[#allocation65_spill] sm:$0xff] }
 0x1cc   : > { %1320 = vmatprep.subr.bf16.mxu0 %v1639_v43  ;;  %1748 = vmatpush3.bf16.msra.mxu1 %v1640_v58  ;;  %v1643_v46 = vcombine.low %v2738_v54, %v2737_v57  ;;  %v1163_v43 = vpack.c.bf16 %v2063_v33, %v2063_v33  ;;  %v1131_v57 = vunpack.c.l.bf16 %v903_v55 }
 0x1cd   : > { %1749 = vmatprep.subr.bf16.mxu1 %v2084_v0 }
 0x1cf   : > { %1321 = vmatpush1.bf16.msra.mxu0 %v1638_v39  ;;  %v2739_v39 = vld [vmem:[#allocation67_spill] sm:$0xff] }
 0x1d0   : > { %1322 = vmatprep.subr.bf16.mxu0 %v1642_v42  ;;  %1750 = vmatpush3.bf16.msra.mxu1 %v1643_v46  ;;  %v910_v47 = vrot.slane %v2740_v50, %v2739_v39  ;;  %v2741_v42 = vld [vmem:[#allocation69_spill] sm:$0xff] }
 0x1d1   : > { %v914_v58 = vrot.slane %v2740_v50, %v2741_v42 }
 0x1d3   : > { %1323 = vmatpush1.bf16.msra.mxu0 %v1641_v52  ;;  %1752 = vmatmul.mubr.bf16.vlgmr.msra.gmra.mrb[4].mxu1 %v1163_v43  ;;  %v1142_v52 = vunpack.c.l.bf16 %v1140_v1  ;;  %v2742_v1 = vld [vmem:[#allocation68_spill] sm:$0xff] }
 0x1d6   : > { %1341 = vmatmul.mubr.bf16.vlgmr.msra.gmra.mrb[4].mxu0 %v1163_v43 }
 0x285   : > { %v1125_v43 = vpop.f32.mrb[0].mxu1 }
 0x286   : > { %v1733_v6 = vpop.f32.mrb[1].mxu1 }
 0x287   : > { %v1128_v7 = vpop.f32.mrb[2].mxu1 }
 0x288   : > { %v1734_v9 = vpop.f32.mrb[3].mxu1  ;;  %v1161_v7 = vld [vmem:[%s1160_s0 + $0xc] sm:$0xff] }
 0x289   : > { %v1084_v54 = vpop.f32.mrb[0].mxu0  ;;  %v2743_v9 = vld [vmem:[#allocation66_spill] sm:$0xff] }
 0x28a   : > { %v1085_v2 = vadd.f32 %v1084_v54, %v910_v47  ;;  %v1086_v3 = vpop.f32.mrb[1].mxu0 }
 0x28b   : > { %v1087_v0 = vadd.f32 %v1086_v3, %v914_v58  ;;  %v1088_v46 = vpop.f32.mrb[2].mxu0  ;;  %v1172_v58 = vrot.slane %v2743_v9, %v2741_v42 }
 0x28c   : > { %v1132_v4 = vadd.f32 %v1131_v57, %v1085_v2  ;;  %v1089_v5 = vpop.f32.mrb[3].mxu0  ;;  %v918_v2 = vrot.slane %v2740_v50, %v2742_v1  ;;  %v1398_v57 = vrot.slane %v1161_v7, 4 }
 0x28d   : > { %v1143_v10 = vadd.f32 %v1142_v52, %v1087_v0  ;;  %v904_v5 = vld [vmem:[%s902_s17 + $0x8] sm:$0xf]  ;;  %v1389_v0 = vunpack.c.l.bf16 %v1161_v7 }
 0x28e   : > { %v1617_v8 = vmul.f32 -1.442695, %v1132_v4  ;;  %v1126_v6 = vadd.f32 %v1125_v43, %v918_v2  ;;  %v1400_v2 = vunpack.c.l.bf16 %v1398_v57 }
 0x28f   : > { %v1618_v11 = vmul.f32 -1.442695, %v1143_v10  ;;  %v1168_v10 = vrot.slane %v2743_v9, %v2739_v39 }
 0x290   : > { %1887 = vpow2.f32 %v1617_v8  ;;  %v1151_v8 = vunpack.c.l.bf16 %v904_v5 }
 0x291   : > { %1889 = vpow2.f32 %v1618_v11 }
 0x29a   : > { %v1888_v55 = vpop.eup %1887 }
 0x29b   : > { %v1136_v47 = vadd.f32 1.0, %v1888_v55  ;;  %v1890_v3 = vpop.eup %1889 }
 0x29c   : > { %v1147_v4 = vadd.f32 1.0, %v1890_v3 }
 0x29d   : > { %1891 = vrcp.f32 %v1136_v47 }
 0x29e   : > { %1893 = vrcp.f32 %v1147_v4 }
 0x2a6   : > { %v1383_v5 = vpop.f32.mrb[4].mxu1 }
 0x2a7   : > { %v1892_v11 = vpop.eup %1891  ;;  %v1753_v14 = vpop.f32.mrb[5].mxu1 }
 0x2a8   : > { %v1150_v54 = vmul.f32 %v1892_v11, %v1126_v6  ;;  %v1386_v15 = vpop.f32.mrb[6].mxu1  ;;  %v1894_v4 = vpop.eup %1893 }
 0x2a9   : > { %v1342_v52 = vpop.f32.mrb[4].mxu0  ;;  %v1754_v17 = vpop.f32.mrb[7].mxu1  ;;  %v1154_v7 = vsub.f32 1.0, %v1894_v4  ;;  %v1162_v15 = vld [vmem:[%s1160_s0 + $0x14] sm:$0xf] }
 0x2aa   : > { %v1152_v46 = vadd.f32 %v1151_v8, %v1150_v54  ;;  %v1343_v55 = vadd.f32 %v1342_v52, %v1168_v10  ;;  %v1344_v47 = vpop.f32.mrb[5].mxu0  ;;  %v1156_v10 = vmul.f32 %v2067_v61, %v1894_v4 }
 0x2ab   : > { %v1345_v43 = vadd.f32 %v1344_v47, %v1172_v58  ;;  %v1346_v3 = vpop.f32.mrb[6].mxu0 }
 0x2ac   : > { %1895 = vtanh.f32 %v1152_v46  ;;  %v1390_v12 = vadd.f32 %v1389_v0, %v1343_v55  ;;  %v1347_v13 = vpop.f32.mrb[7].mxu0 }
 0x2ad   : > { %v1401_v18 = vadd.f32 %v1400_v2, %v1345_v43 }
 0x2ae   : > { %v1644_v16 = vmul.f32 -1.442695, %v1390_v12  ;;  %v1176_v12 = vrot.slane %v2743_v9, %v2742_v1 }
 0x2af   : > { %v1645_v6 = vmul.f32 -1.442695, %v1401_v18  ;;  %v1409_v18 = vunpack.c.l.bf16 %v1162_v15 }
 0x2b0   : > { %1897 = vpow2.f32 %v1644_v16  ;;  %v1384_v17 = vadd.f32 %v1383_v5, %v1176_v12 }
 0x2b1   : > { %1899 = vpow2.f32 %v1645_v6 }
 0x2b6   : > { %v1896_v8 = vpop.eup %1895 }
 0x2b7   : > { %v1155_v11 = vmul.f32 %v1896_v8, %v1154_v7 }
 0x2b9   : > { %v1157_v58 = vadd.f32 %v1156_v10, %v1155_v11  }
 0x2ba   : > { %v1898_v57 = vpop.eup %1897 }
 0x2bb   : > { %1418 = vst [vmem:[%s1417_s21] sm:$0xff] %v1157_v58  ;;  %v1394_v13 = vadd.f32 1.0, %v1898_v57  ;;  %v1900_v14 = vpop.eup %1899 }
 0x2bc   : > { %v1405_v16 = vadd.f32 1.0, %v1900_v14 }
 0x2bd   : > { %1901 = vrcp.f32 %v1394_v13 }
 0x2be   : > { %1903 = vrcp.f32 %v1405_v16 }
 0x2c2   :  { %v1422_v3 = vld [vmem:[#allocation3] sm:$0xff] (%p893_p4)  ;;  %v1423_v5 = vld [vmem:[#allocation3 + $0x8] sm:$0xff] (%p893_p4)  ;;  %v1424_v10 = vld [vmem:[#allocation3 + $0x10] sm:$0xff] (%p893_p4) }
 0x2c3   :  { %v1425_v11 = vld [vmem:[#allocation3 + $0x18] sm:$0xff] (%p893_p4)  ;;  %v1426_v14 = vld [vmem:[#allocation3 + $0x20] sm:$0xff] (%p893_p4) }
 0x2c7   : > { %v1902_v54 = vpop.eup %1901 }
 0x2c8   : > { %v1408_v61 = vmul.f32 %v1902_v54, %v1384_v17  ;;  %v1904_v52 = vpop.eup %1903  ;;  %v1427_v17 = vld [vmem:[#allocation3 + $0x28] sm:$0xff] (%p893_p4) }
 0x2c9   : > { %v1412_v46 = vsub.f32 1.0, %v1904_v52  ;;  %v1414_v47 = vmul.f32 %v2063_v33, %v1904_v52 }
 0x2ca   : > { %v1410_v0 = vadd.f32 %v1409_v18, %v1408_v61  ;;  %v2745_v61 = vmov %v1157_v58 }
 0x2cc   : > { %1905 = vtanh.f32 %v1410_v0 }
 0x2d5   :  { %895 = sbr.rel (!%p893_p4) target bundleno = 399 (0x18f), region = 83 }
 0x2d6   : > { %v1906_v55 = vpop.eup %1905 }
 0x2d7   : > { %v1413_v43 = vmul.f32 %v1906_v55, %v1412_v46 }
 0x2d9   : > { %v1415_v2 = vadd.f32 %v1414_v47, %v1413_v43  }
 0x2db   : > { %1421 = vst [vmem:[%s1420_s23] sm:$0xff] %v1415_v2  ;;  %v2744_v33 = vmov %v1415_v2  ;;  %v1462_v6 = vadd.f32 (%p893_p4), %v1415_v2, %v1157_v58 }
 0x2dd   :  { %1463 = vst [vmem:[#allocation14] sm:$0xff] %v1462_v6 }
 0x2e2   :  { %v1430_v4 = vld [vmem:[#allocation4] sm:$0xff]  ;;  %v1431_v7 = vld [vmem:[#allocation4 + $0x8] sm:$0xff]  ;;  %v1432_v13 = vld [vmem:[#allocation4 + $0x10] sm:$0xff] }
 0x2e3   :  { %v1438_v8 = vadd.f32 %v1430_v4, %v1422_v3  ;;  %v1439_v57 = vadd.f32 %v1431_v7, %v1423_v5  ;;  %v1433_v12 = vld [vmem:[#allocation4 + $0x18] sm:$0xff]  ;;  %v1440_v15 = vadd.f32 %v1432_v13, %v1424_v10  ;;  %v1434_v18 = vld [vmem:[#allocation4 + $0x20] sm:$0xff]  ;;  %v1435_v19 = vld [vmem:[#allocation4 + $0x28] sm:$0xff] }
 0x2e4   :  { %v1441_v16 = vadd.f32 %v1433_v12, %v1425_v11 }
 0x2e5   :  { %2006 = shalt.err (!%p2003_p9)
}
 0x2e6   :  { %s2007_s30 = scalar_lea.hbm %s2613_s8, 128 }
 0x2e7   :  { %p2008_p10 = scmp.ne.s32.totalorder %s2613_s8, %s2007_s30  ;;  %p2011_p11 = scmp.lt.u32.totalorder %s2007_s30, %s2613_s8 }
 0x2e9   :  { %p2013_p12 = pnand %p2011_p11, %p2008_p10 }
 0x2eb   :  { %2016 = shalt.err (!%p2013_p12)
}
 0x2ec   :  { %1485 = dma.vmem_to_hbm [thread:$0]  %s1483_s25, 128, %s2613_s8, [#allocation15]   ;;  %v1677_v20 = vpack.c.bf16 %v1439_v57, %v1438_v8  ;;  %v1442_v21 = vadd.f32 %v1434_v18, %v1426_v14  ;;  %v1443_v22 = vadd.f32 %v1435_v19, %v1427_v17  ;;  %v1428_v23 = vld [vmem:[#allocation3 + $0x30] sm:$0xff]  ;;  %v1429_v24 = vld [vmem:[#allocation3 + $0x38] sm:$0xff]  ;;  %v1682_v26 = vpack.c.bf16 %v1441_v16, %v1440_v15 }
 0x2ed   :  { %v1436_v25 = vld [vmem:[#allocation4 + $0x30] sm:$0xff]  ;;  %v1437_v27 = vld [vmem:[#allocation4 + $0x38] sm:$0xff]  ;;  %s2088_s13 = smov [#allocation13]  }
 0x2ee   :  { %v1444_v28 = vadd.f32 %v1436_v25, %v1428_v23  ;;  %s1469_s4 = sshll.u32 %s2088_s13, 4  ;;  %1678 = vst [vmem:[#allocation13] sm:$0xff] %v1677_v20   ;;  %v1687_v29 = vpack.c.bf16 %v1443_v22, %v1442_v21  ;;  %v1445_v30 = vadd.f32 %v1437_v27, %v1429_v24  ;;  %1694 = vst [vmem:[#allocation13 + $0x8] sm:$0xff] %v1682_v26   ;;  %s1470_s4 = int_to_ptr.vmem [resolvable:$true] %s1469_s4 }
 0x2ef   :  { %s2017_s8 = scalar_lea.vmem %s1470_s4, 512  ;;  %p2022_p0 = scmp.lt.s32.totalorder %s1470_s4, %s1470_s4 }
 0x2f0   :  { %1695 = vst [vmem:[#allocation13 + $0x10] sm:$0xff] %v1687_v29   ;;  %v1692_v31 = vpack.c.bf16 %v1445_v30, %v1444_v28  ;;  %p2018_p13 = scmp.ne.s32.totalorder %s1470_s4, %s2017_s8  ;;  %p2023_p1 = scmp.lt.s32.totalorder %s2017_s8, %s2017_s8 }
 0x2f2   :  { %1696 = vst [vmem:[#allocation13 + $0x18] sm:$0xff] %v1692_v31   ;;  %p2024_p2 = por %p2023_p1, %p2022_p0 }
 0x2f4   :  { %p2025_p3 = pnand %p2024_p2, %p2018_p13 }
 0x2f6   :  { %2028 = shalt.err (!%p2025_p3)
}
 0x2f7   :  { %s2029_s15 = scalar_lea.hbm %s2612_s7, 512 }
 0x2f8   :  { %p2030_p4 = scmp.ne.s32.totalorder %s2612_s7, %s2029_s15  ;;  %p2033_p5 = scmp.lt.u32.totalorder %s2029_s15, %s2612_s7 }
 0x2fa   :  { %p2035_p6 = pnand %p2033_p5, %p2030_p4 }
 0x2fc   :  { %2038 = shalt.err (!%p2035_p6)
}
 0x2fd   :  { %1475 = dma.vmem_to_hbm [thread:$0]  %s1470_s4, 512, %s2612_s7, [#allocation7], %s2077_s1, %s2077_s1, %s2078_s28  }
 0x2fe   :  { %2057 = dma.done.wait [#allocation7], 512  }
 0x2ff   :  { %2058 = vsyncadd [#allocation7], 4294966784 }
 0x300   :  { %2059 = dma.done.wait [#allocation15], 128  }
 0x301   :  { %2060 = vsyncadd [#allocation15], 4294967168 }
 0x302   :  { %1492 = vsyncpa [#allocation6], 1 }
 0x303   :  { %1493 = vsyncpa [#allocation9], 1 }
 0x304   :  { %1494 = vsyncpa [#allocation12], 1 }
 0x305   :  { %1495 = vsyncpa [#allocation7], 1 }
 0x306   :  { %1496 = vsyncpa [#allocation15], 1 }

</bundles_post_ra>
